<compile_context>
chip_gen: v5e
topology: v5e:2x2
jax: 0.10.0
libtpu: 0.0.40
codegen_flags: <defaults>
</compile_context>

<pallas_src>
import functools

import jax
import jax.numpy as jnp
from jax.experimental import pallas as pl
from jax.experimental.pallas import tpu as pltpu


def _round_up(x, m):
    return (x + m - 1) // m * m


def _pick_tile(p, max_tile=2048):
    """Largest multiple of 128 <= max_tile dividing round_up(p, 128)."""
    p128 = _round_up(p, 128)
    tile = 128
    for k in range(2, max_tile // 128 + 1):
        if p128 % (128 * k) == 0:
            tile = 128 * k
    return tile, p128


# ----------------------------- Pallas kernel --------------------------------

def _detect_level_kernel(x_ref, g_ref, w_ref, meta_ref, raw_ref, dec_ref):
    """One (batch, pixel-tile) step of a single detection level.

    x_ref   : (1, C, TP)    bf16  NCHW activations, pixels on the lane axis
    g_ref   : (2, TP)       f32   row0 = gx, row1 = gy per pixel
    w_ref   : (Cout, C)     bf16  1x1 conv weight (whole array, VMEM resident)
    meta_ref: (Cout, 8)     f32   col0 bias, col1 decode scale, cols2-6 masks
    raw_ref : (1, Cout, TP) f32   raw conv output (training-mode layout source)
    dec_ref : (1, Cout, TP) f32   decoded boxes / conf / cls
    """
    x = x_ref[0]                       # (C, TP) bf16
    w = w_ref[...]                     # (Cout, C) bf16
    meta = meta_ref[...]               # (Cout, 8) f32

    # bf16 MXU inputs, f32 accumulation; bias add in f32.
    conv = jnp.dot(w, x, preferred_element_type=jnp.float32) + meta[:, 0:1]
    raw_ref[0] = conv

    # Decode (all f32, only the Cout rows that need it).
    s = jax.nn.sigmoid(conv)
    gx = g_ref[0:1, :]                 # (1, TP)
    gy = g_ref[1:2, :]
    grid_add = meta[:, 2:3] * gx + meta[:, 3:4] * gy   # nonzero on x/y rows
    xyv = s * 2.0 - 0.5 + grid_add
    whv = (s * 2.0) ** 2
    dec = meta[:, 4:5] * xyv + meta[:, 5:6] * whv + meta[:, 6:7] * s
    dec_ref[0] = dec * meta[:, 1:2]    # stride on xy rows, anchor on wh rows


# ------------------------------- wrapper -------------------------------------

def detect_forward(xs, weights, biases, anchors, strides, na, no,
                   max_tile=2048):
    """Fused YOLOv5 Detect forward (inference). Returns (z_cat, x_list)."""
    nl = len(xs)
    cout = na * no
    o_idx = jnp.tile(jnp.arange(no), (na,))        # per-channel output index
    a_idx = jnp.repeat(jnp.arange(na), no)         # per-channel anchor index

    z_list, x_list = [], []
    for i in range(nl):
        B, C, H, W = map(int, xs[i].shape)
        P = H * W
        tile, p_pad = _pick_tile(P, max_tile)
        n_tiles = p_pad // tile

        # Activations: NCHW -> (B, C, P) bf16, pixel-padded to a tile multiple.
        x2 = xs[i].reshape(B, C, P).astype(jnp.bfloat16)
        if p_pad != P:
            x2 = jnp.pad(x2, ((0, 0), (0, 0), (0, p_pad - P)))

        # Per-pixel grid coordinates as a tiny side input (f32).
        gy_m, gx_m = jnp.meshgrid(jnp.arange(H, dtype=jnp.float32),
                                  jnp.arange(W, dtype=jnp.float32),
                                  indexing="ij")
        g = jnp.stack([gx_m.reshape(-1), gy_m.reshape(-1)], axis=0)
        if p_pad != P:
            g = jnp.pad(g, ((0, 0), (0, p_pad - P)))

        # 1x1 conv weight (bf16) and per-channel meta table (f32).
        w2 = weights[i][:, :, 0, 0].astype(jnp.bfloat16)          # (Cout, C)
        col_mul = jnp.where(
            o_idx < 2, jnp.float32(strides[i]),
            jnp.where(o_idx == 2, anchors[i][a_idx, 0],
                      jnp.where(o_idx == 3, anchors[i][a_idx, 1], 1.0)))
        meta = jnp.stack([
            biases[i].astype(jnp.float32),
            col_mul.astype(jnp.float32),
            (o_idx == 0).astype(jnp.float32),
            (o_idx == 1).astype(jnp.float32),
            (o_idx < 2).astype(jnp.float32),
            ((o_idx >= 2) & (o_idx < 4)).astype(jnp.float32),
            (o_idx >= 4).astype(jnp.float32),
            jnp.zeros((cout,), jnp.float32),
        ], axis=1)                                                # (Cout, 8)

        raw, dec = pl.pallas_call(
            _detect_level_kernel,
            out_shape=(jax.ShapeDtypeStruct((B, cout, p_pad), jnp.float32),
                       jax.ShapeDtypeStruct((B, cout, p_pad), jnp.float32)),
            grid=(B, n_tiles),
            in_specs=[
                pl.BlockSpec((1, C, tile), lambda b, p: (b, 0, p)),
                pl.BlockSpec((2, tile), lambda b, p: (0, p)),
                pl.BlockSpec((cout, C), lambda b, p: (0, 0)),     # resident
                pl.BlockSpec((cout, 8), lambda b, p: (0, 0)),     # resident
            ],
            out_specs=(
                pl.BlockSpec((1, cout, tile), lambda b, p: (b, 0, p)),
                pl.BlockSpec((1, cout, tile), lambda b, p: (b, 0, p)),
            ),
            compiler_params=pltpu.CompilerParams(
                dimension_semantics=("parallel", "parallel"),
                vmem_limit_bytes=32 * 1024 * 1024),
        )(x2, g, w2, meta)

        # Same layout plumbing the original module performs (view + permute).
        raw = raw[:, :, :P].reshape(B, na, no, H, W).transpose(0, 1, 3, 4, 2)
        dec = dec[:, :, :P].reshape(B, na, no, H, W).transpose(0, 1, 3, 4, 2)
        x_list.append(raw)
        z_list.append(dec.reshape(B, na * H * W, no))

    return jnp.concatenate(z_list, axis=1), x_list


# ----------------------------- pure-JAX reference ----------------------------

def _ref_forward(xs, weights, biases, anchors, strides, na, no):
    # The conv uses bf16 MXU inputs with f32 accumulation to match the
    # kernel's (intentional, perf-review-requested) precision; all decode math
    # is f32 in both, so this tightly checks the kernel's decode/packing logic.
    z, x_out = [], []
    for i, x_i in enumerate(xs):
        conv = jnp.einsum("bchw,oc->bohw",
                          x_i.astype(jnp.bfloat16),
                          weights[i][:, :, 0, 0].astype(jnp.bfloat16),
                          preferred_element_type=jnp.float32)
        conv = conv + biases[i][None, :, None, None]
        bs, _, ny, nx = conv.shape
        xr = conv.reshape(bs, na, no, ny, nx).transpose(0, 1, 3, 4, 2)
        x_out.append(xr)
        y = jax.nn.sigmoid(xr)
        gy, gx = jnp.meshgrid(jnp.arange(ny, dtype=jnp.float32),
                              jnp.arange(nx, dtype=jnp.float32), indexing="ij")
        grid = jnp.stack([gx, gy], axis=-1).reshape(1, 1, ny, nx, 2)
        anchor_grid = anchors[i].reshape(1, na, 1, 1, 2)
        xy = (y[..., 0:2] * 2.0 - 0.5 + grid) * strides[i]
        wh = (y[..., 2:4] * 2.0) ** 2 * anchor_grid
        y = jnp.concatenate([xy, wh, y[..., 4:]], axis=-1)
        z.append(y.reshape(bs, -1, no))
    return jnp.concatenate(z, axis=1), x_out


# ------------------------------------ main -----------------------------------

if __name__ == "__main__":
    key = jax.random.PRNGKey(0)

    # Small Detect config.
    nc = 3                      # classes
    no = nc + 5                 # outputs per anchor
    anchors_cfg = [[10, 13, 16, 30, 33, 23],
                   [30, 61, 62, 45, 59, 119],
                   [116, 90, 156, 198, 373, 326]]
    nl = len(anchors_cfg)
    na = len(anchors_cfg[0]) // 2
    anchors = jnp.asarray(anchors_cfg, dtype=jnp.float32).reshape(nl, na, 2)
    strides = [8.0, 16.0, 32.0]

    B = 2
    ch = (16, 32, 64)
    spatial = [(16, 16), (8, 8), (4, 4)]

    keys = jax.random.split(key, 3 * nl)
    xs, weights, biases = [], [], []
    for i in range(nl):
        H, W = spatial[i]
        xs.append(jax.random.normal(keys[3 * i], (B, ch[i], H, W),
                                    dtype=jnp.float32))
        weights.append(0.1 * jax.random.normal(
            keys[3 * i + 1], (no * na, ch[i], 1, 1), dtype=jnp.float32))
        biases.append(0.1 * jax.random.normal(
            keys[3 * i + 2], (no * na,), dtype=jnp.float32))

    fwd = jax.jit(functools.partial(detect_forward, strides=strides,
                                    na=na, no=no))
    z_cat, x_list = fwd(xs, weights, biases, anchors)
    jax.block_until_ready(z_cat)
    for xp in x_list:
        jax.block_until_ready(xp)

    # Check against the pure-JAX reference.
    z_ref, x_ref = _ref_forward(xs, weights, biases, anchors, strides, na, no)
    assert z_cat.shape == (B, sum(na * h * w for h, w in spatial), no)
    assert jnp.allclose(z_cat, z_ref, atol=1e-2, rtol=1e-3)
    for a, b in zip(x_list, x_ref):
        assert a.shape == b.shape
        assert jnp.allclose(a, b, atol=1e-2, rtol=1e-3)

    print("KERNEL_OK")
</pallas_src>

<mosaic_0001>
module attributes {stable_mosaic.version = 11 : i64} {
  func.func @_detect_level_kernel(%arg0: i32, %arg1: i32, %arg2: memref<1x16x256xbf16, #tpu.memory_space<vmem>>, %arg3: memref<2x256xf32, #tpu.memory_space<vmem>>, %arg4: memref<24x16xbf16, #tpu.memory_space<vmem>>, %arg5: memref<24x8xf32, #tpu.memory_space<vmem>>, %arg6: memref<1x24x256xf32, #tpu.memory_space<vmem>>, %arg7: memref<1x24x256xf32, #tpu.memory_space<vmem>>) attributes {dimension_semantics = [#tpu.dimension_semantics<parallel>, #tpu.dimension_semantics<parallel>], iteration_bounds = array<i64: 2, 1>, scalar_prefetch = 0 : i64, scratch_operands = 0 : i64, tpu.core_type = #tpu.core_type<tc>, window_params = [{transform_indices = @transform_0, window_bounds = array<i64: 1, 16, 256>}, {transform_indices = @transform_1, window_bounds = array<i64: 2, 256>}, {pipeline_mode = #tpu.pipeline_mode<synchronous>, transform_indices = @transform_2, window_bounds = array<i64: 24, 16>}, {pipeline_mode = #tpu.pipeline_mode<synchronous>, transform_indices = @transform_3, window_bounds = array<i64: 24, 8>}, {transform_indices = @transform_4, window_bounds = array<i64: 1, 24, 256>}, {transform_indices = @transform_5, window_bounds = array<i64: 1, 24, 256>}]} {
    %c0 = arith.constant 0 : index
    %c0_0 = arith.constant 0 : index
    %c0_1 = arith.constant 0 : index
    %0 = vector.load %arg2[%c0, %c0_0, %c0_1] : memref<1x16x256xbf16, #tpu.memory_space<vmem>>, vector<1x16x256xbf16>
    %1 = vector.shape_cast %0 : vector<1x16x256xbf16> to vector<16x256xbf16>
    %c0_2 = arith.constant 0 : index
    %c0_3 = arith.constant 0 : index
    %2 = vector.load %arg4[%c0_2, %c0_3] : memref<24x16xbf16, #tpu.memory_space<vmem>>, vector<24x16xbf16>
    %c0_4 = arith.constant 0 : index
    %c0_5 = arith.constant 0 : index
    %3 = vector.load %arg5[%c0_4, %c0_5] : memref<24x8xf32, #tpu.memory_space<vmem>>, vector<24x8xf32>
    %cst = arith.constant dense<0.000000e+00> : vector<24x256xf32>
    %4 = tpu.matmul %2, %1, %cst {dimension_numbers = #tpu.dot_dimension_numbers<[1], [0], [0], [1], [0, 0, 1, 1], [], []>} : vector<24x16xbf16>, vector<16x256xbf16>, vector<24x256xf32> -> vector<24x256xf32>
    %5 = vector.extract_strided_slice %3 {offsets = [0, 0], sizes = [24, 1], strides = [1, 1]} : vector<24x8xf32> to vector<24x1xf32>
    %6 = vector.broadcast %5 : vector<24x1xf32> to vector<24x256xf32>
    %7 = arith.addf %4, %6 : vector<24x256xf32>
    %c0_6 = arith.constant 0 : index
    %c0_7 = arith.constant 0 : index
    %c0_8 = arith.constant 0 : index
    %8 = vector.load %arg6[%c0_6, %c0_7, %c0_8] : memref<1x24x256xf32, #tpu.memory_space<vmem>>, vector<1x24x256xf32>
    %9 = vector.shape_cast %8 : vector<1x24x256xf32> to vector<24x256xf32>
    %10 = vector.shape_cast %7 : vector<24x256xf32> to vector<1x24x256xf32>
    tpu.vector_store %arg6[%c0_6, %c0_7, %c0_8], %10 {strides = array<i32>} : memref<1x24x256xf32, #tpu.memory_space<vmem>>, vector<1x24x256xf32>,
    %11 = arith.negf %7 : vector<24x256xf32>
    %12 = math.exp %11 : vector<24x256xf32>
    %cst_9 = arith.constant 1.000000e+00 : f32
    %13 = vector.broadcast %cst_9 : f32 to vector<24x256xf32>
    %14 = arith.addf %13, %12 : vector<24x256xf32>
    %15 = arith.divf %13, %14 : vector<24x256xf32>
    %c0_10 = arith.constant 0 : index
    %c0_11 = arith.constant 0 : index
    %16 = vector.load %arg3[%c0_10, %c0_11] : memref<2x256xf32, #tpu.memory_space<vmem>>, vector<1x256xf32>
    %c1 = arith.constant 1 : index
    %c0_12 = arith.constant 0 : index
    %17 = vector.load %arg3[%c1, %c0_12] : memref<2x256xf32, #tpu.memory_space<vmem>>, vector<1x256xf32>
    %18 = vector.extract_strided_slice %3 {offsets = [0, 2], sizes = [24, 1], strides = [1, 1]} : vector<24x8xf32> to vector<24x1xf32>
    %19 = vector.broadcast %18 : vector<24x1xf32> to vector<24x256xf32>
    %20 = vector.broadcast %16 : vector<1x256xf32> to vector<24x256xf32>
    %21 = arith.mulf %19, %20 : vector<24x256xf32>
    %22 = vector.extract_strided_slice %3 {offsets = [0, 3], sizes = [24, 1], strides = [1, 1]} : vector<24x8xf32> to vector<24x1xf32>
    %23 = vector.broadcast %22 : vector<24x1xf32> to vector<24x256xf32>
    %24 = vector.broadcast %17 : vector<1x256xf32> to vector<24x256xf32>
    %25 = arith.mulf %23, %24 : vector<24x256xf32>
    %26 = arith.addf %21, %25 : vector<24x256xf32>
    %cst_13 = arith.constant 2.000000e+00 : f32
    %27 = vector.broadcast %cst_13 : f32 to vector<24x256xf32>
    %28 = arith.mulf %15, %27 : vector<24x256xf32>
    %cst_14 = arith.constant 5.000000e-01 : f32
    %29 = vector.broadcast %cst_14 : f32 to vector<24x256xf32>
    %30 = arith.subf %28, %29 : vector<24x256xf32>
    %31 = arith.addf %30, %26 : vector<24x256xf32>
    %cst_15 = arith.constant 2.000000e+00 : f32
    %32 = vector.broadcast %cst_15 : f32 to vector<24x256xf32>
    %33 = arith.mulf %15, %32 : vector<24x256xf32>
    %34 = arith.mulf %33, %33 : vector<24x256xf32>
    %35 = vector.extract_strided_slice %3 {offsets = [0, 4], sizes = [24, 1], strides = [1, 1]} : vector<24x8xf32> to vector<24x1xf32>
    %36 = vector.broadcast %35 : vector<24x1xf32> to vector<24x256xf32>
    %37 = arith.mulf %36, %31 : vector<24x256xf32>
    %38 = vector.extract_strided_slice %3 {offsets = [0, 5], sizes = [24, 1], strides = [1, 1]} : vector<24x8xf32> to vector<24x1xf32>
    %39 = vector.broadcast %38 : vector<24x1xf32> to vector<24x256xf32>
    %40 = arith.mulf %39, %34 : vector<24x256xf32>
    %41 = arith.addf %37, %40 : vector<24x256xf32>
    %42 = vector.extract_strided_slice %3 {offsets = [0, 6], sizes = [24, 1], strides = [1, 1]} : vector<24x8xf32> to vector<24x1xf32>
    %43 = vector.broadcast %42 : vector<24x1xf32> to vector<24x256xf32>
    %44 = arith.mulf %43, %15 : vector<24x256xf32>
    %45 = arith.addf %41, %44 : vector<24x256xf32>
    %46 = vector.extract_strided_slice %3 {offsets = [0, 1], sizes = [24, 1], strides = [1, 1]} : vector<24x8xf32> to vector<24x1xf32>
    %47 = vector.broadcast %46 : vector<24x1xf32> to vector<24x256xf32>
    %48 = arith.mulf %45, %47 : vector<24x256xf32>
    %c0_16 = arith.constant 0 : index
    %c0_17 = arith.constant 0 : index
    %c0_18 = arith.constant 0 : index
    %49 = vector.load %arg7[%c0_16, %c0_17, %c0_18] : memref<1x24x256xf32, #tpu.memory_space<vmem>>, vector<1x24x256xf32>
    %50 = vector.shape_cast %49 : vector<1x24x256xf32> to vector<24x256xf32>
    %51 = vector.shape_cast %48 : vector<24x256xf32> to vector<1x24x256xf32>
    tpu.vector_store %arg7[%c0_16, %c0_17, %c0_18], %51 {strides = array<i32>} : memref<1x24x256xf32, #tpu.memory_space<vmem>>, vector<1x24x256xf32>,
    return
  }
  func.func @transform_0(%arg0: i32, %arg1: i32) -> (i32, i32, i32) {
    %c0_i32 = arith.constant 0 : i32
    %c0_i32_0 = arith.constant 0 : i32
    return %arg0, %c0_i32, %arg1 : i32, i32, i32
  }
  func.func @transform_1(%arg0: i32, %arg1: i32) -> (i32, i32) {
    %c0_i32 = arith.constant 0 : i32
    %c0_i32_0 = arith.constant 0 : i32
    return %c0_i32, %arg1 : i32, i32
  }
  func.func @transform_2(%arg0: i32, %arg1: i32) -> (i32, i32) {
    %c0_i32 = arith.constant 0 : i32
    %c0_i32_0 = arith.constant 0 : i32
    %c0_i32_1 = arith.constant 0 : i32
    return %c0_i32, %c0_i32_0 : i32, i32
  }
  func.func @transform_3(%arg0: i32, %arg1: i32) -> (i32, i32) {
    %c0_i32 = arith.constant 0 : i32
    %c0_i32_0 = arith.constant 0 : i32
    %c0_i32_1 = arith.constant 0 : i32
    return %c0_i32, %c0_i32_0 : i32, i32
  }
  func.func @transform_4(%arg0: i32, %arg1: i32) -> (i32, i32, i32) {
    %c0_i32 = arith.constant 0 : i32
    %c0_i32_0 = arith.constant 0 : i32
    return %arg0, %c0_i32, %arg1 : i32, i32, i32
  }
  func.func @transform_5(%arg0: i32, %arg1: i32) -> (i32, i32, i32) {
    %c0_i32 = arith.constant 0 : i32
    %c0_i32_0 = arith.constant 0 : i32
    return %arg0, %c0_i32, %arg1 : i32, i32, i32
  }
}

module attributes {stable_mosaic.version = 11 : i64} {
  func.func @_detect_level_kernel(%arg0: i32, %arg1: i32, %arg2: memref<1x32x128xbf16, #tpu.memory_space<vmem>>, %arg3: memref<2x128xf32, #tpu.memory_space<vmem>>, %arg4: memref<24x32xbf16, #tpu.memory_space<vmem>>, %arg5: memref<24x8xf32, #tpu.memory_space<vmem>>, %arg6: memref<1x24x128xf32, #tpu.memory_space<vmem>>, %arg7: memref<1x24x128xf32, #tpu.memory_space<vmem>>) attributes {dimension_semantics = [#tpu.dimension_semantics<parallel>, #tpu.dimension_semantics<parallel>], iteration_bounds = array<i64: 2, 1>, scalar_prefetch = 0 : i64, scratch_operands = 0 : i64, tpu.core_type = #tpu.core_type<tc>, window_params = [{transform_indices = @transform_0, window_bounds = array<i64: 1, 32, 128>}, {transform_indices = @transform_1, window_bounds = array<i64: 2, 128>}, {pipeline_mode = #tpu.pipeline_mode<synchronous>, transform_indices = @transform_2, window_bounds = array<i64: 24, 32>}, {pipeline_mode = #tpu.pipeline_mode<synchronous>, transform_indices = @transform_3, window_bounds = array<i64: 24, 8>}, {transform_indices = @transform_4, window_bounds = array<i64: 1, 24, 128>}, {transform_indices = @transform_5, window_bounds = array<i64: 1, 24, 128>}]} {
    %c0 = arith.constant 0 : index
    %c0_0 = arith.constant 0 : index
    %c0_1 = arith.constant 0 : index
    %0 = vector.load %arg2[%c0, %c0_0, %c0_1] : memref<1x32x128xbf16, #tpu.memory_space<vmem>>, vector<1x32x128xbf16>
    %1 = vector.shape_cast %0 : vector<1x32x128xbf16> to vector<32x128xbf16>
    %c0_2 = arith.constant 0 : index
    %c0_3 = arith.constant 0 : index
    %2 = vector.load %arg4[%c0_2, %c0_3] : memref<24x32xbf16, #tpu.memory_space<vmem>>, vector<24x32xbf16>
    %c0_4 = arith.constant 0 : index
    %c0_5 = arith.constant 0 : index
    %3 = vector.load %arg5[%c0_4, %c0_5] : memref<24x8xf32, #tpu.memory_space<vmem>>, vector<24x8xf32>
    %cst = arith.constant dense<0.000000e+00> : vector<24x128xf32>
    %4 = tpu.matmul %2, %1, %cst {dimension_numbers = #tpu.dot_dimension_numbers<[1], [0], [0], [1], [0, 0, 1, 1], [], []>} : vector<24x32xbf16>, vector<32x128xbf16>, vector<24x128xf32> -> vector<24x128xf32>
    %5 = vector.extract_strided_slice %3 {offsets = [0, 0], sizes = [24, 1], strides = [1, 1]} : vector<24x8xf32> to vector<24x1xf32>
    %6 = vector.broadcast %5 : vector<24x1xf32> to vector<24x128xf32>
    %7 = arith.addf %4, %6 : vector<24x128xf32>
    %c0_6 = arith.constant 0 : index
    %c0_7 = arith.constant 0 : index
    %c0_8 = arith.constant 0 : index
    %8 = vector.load %arg6[%c0_6, %c0_7, %c0_8] : memref<1x24x128xf32, #tpu.memory_space<vmem>>, vector<1x24x128xf32>
    %9 = vector.shape_cast %8 : vector<1x24x128xf32> to vector<24x128xf32>
    %10 = vector.shape_cast %7 : vector<24x128xf32> to vector<1x24x128xf32>
    tpu.vector_store %arg6[%c0_6, %c0_7, %c0_8], %10 {strides = array<i32>} : memref<1x24x128xf32, #tpu.memory_space<vmem>>, vector<1x24x128xf32>,
    %11 = arith.negf %7 : vector<24x128xf32>
    %12 = math.exp %11 : vector<24x128xf32>
    %cst_9 = arith.constant 1.000000e+00 : f32
    %13 = vector.broadcast %cst_9 : f32 to vector<24x128xf32>
    %14 = arith.addf %13, %12 : vector<24x128xf32>
    %15 = arith.divf %13, %14 : vector<24x128xf32>
    %c0_10 = arith.constant 0 : index
    %c0_11 = arith.constant 0 : index
    %16 = vector.load %arg3[%c0_10, %c0_11] : memref<2x128xf32, #tpu.memory_space<vmem>>, vector<1x128xf32>
    %c1 = arith.constant 1 : index
    %c0_12 = arith.constant 0 : index
    %17 = vector.load %arg3[%c1, %c0_12] : memref<2x128xf32, #tpu.memory_space<vmem>>, vector<1x128xf32>
    %18 = vector.extract_strided_slice %3 {offsets = [0, 2], sizes = [24, 1], strides = [1, 1]} : vector<24x8xf32> to vector<24x1xf32>
    %19 = vector.broadcast %18 : vector<24x1xf32> to vector<24x128xf32>
    %20 = vector.broadcast %16 : vector<1x128xf32> to vector<24x128xf32>
    %21 = arith.mulf %19, %20 : vector<24x128xf32>
    %22 = vector.extract_strided_slice %3 {offsets = [0, 3], sizes = [24, 1], strides = [1, 1]} : vector<24x8xf32> to vector<24x1xf32>
    %23 = vector.broadcast %22 : vector<24x1xf32> to vector<24x128xf32>
    %24 = vector.broadcast %17 : vector<1x128xf32> to vector<24x128xf32>
    %25 = arith.mulf %23, %24 : vector<24x128xf32>
    %26 = arith.addf %21, %25 : vector<24x128xf32>
    %cst_13 = arith.constant 2.000000e+00 : f32
    %27 = vector.broadcast %cst_13 : f32 to vector<24x128xf32>
    %28 = arith.mulf %15, %27 : vector<24x128xf32>
    %cst_14 = arith.constant 5.000000e-01 : f32
    %29 = vector.broadcast %cst_14 : f32 to vector<24x128xf32>
    %30 = arith.subf %28, %29 : vector<24x128xf32>
    %31 = arith.addf %30, %26 : vector<24x128xf32>
    %cst_15 = arith.constant 2.000000e+00 : f32
    %32 = vector.broadcast %cst_15 : f32 to vector<24x128xf32>
    %33 = arith.mulf %15, %32 : vector<24x128xf32>
    %34 = arith.mulf %33, %33 : vector<24x128xf32>
    %35 = vector.extract_strided_slice %3 {offsets = [0, 4], sizes = [24, 1], strides = [1, 1]} : vector<24x8xf32> to vector<24x1xf32>
    %36 = vector.broadcast %35 : vector<24x1xf32> to vector<24x128xf32>
    %37 = arith.mulf %36, %31 : vector<24x128xf32>
    %38 = vector.extract_strided_slice %3 {offsets = [0, 5], sizes = [24, 1], strides = [1, 1]} : vector<24x8xf32> to vector<24x1xf32>
    %39 = vector.broadcast %38 : vector<24x1xf32> to vector<24x128xf32>
    %40 = arith.mulf %39, %34 : vector<24x128xf32>
    %41 = arith.addf %37, %40 : vector<24x128xf32>
    %42 = vector.extract_strided_slice %3 {offsets = [0, 6], sizes = [24, 1], strides = [1, 1]} : vector<24x8xf32> to vector<24x1xf32>
    %43 = vector.broadcast %42 : vector<24x1xf32> to vector<24x128xf32>
    %44 = arith.mulf %43, %15 : vector<24x128xf32>
    %45 = arith.addf %41, %44 : vector<24x128xf32>
    %46 = vector.extract_strided_slice %3 {offsets = [0, 1], sizes = [24, 1], strides = [1, 1]} : vector<24x8xf32> to vector<24x1xf32>
    %47 = vector.broadcast %46 : vector<24x1xf32> to vector<24x128xf32>
    %48 = arith.mulf %45, %47 : vector<24x128xf32>
    %c0_16 = arith.constant 0 : index
    %c0_17 = arith.constant 0 : index
    %c0_18 = arith.constant 0 : index
    %49 = vector.load %arg7[%c0_16, %c0_17, %c0_18] : memref<1x24x128xf32, #tpu.memory_space<vmem>>, vector<1x24x128xf32>
    %50 = vector.shape_cast %49 : vector<1x24x128xf32> to vector<24x128xf32>
    %51 = vector.shape_cast %48 : vector<24x128xf32> to vector<1x24x128xf32>
    tpu.vector_store %arg7[%c0_16, %c0_17, %c0_18], %51 {strides = array<i32>} : memref<1x24x128xf32, #tpu.memory_space<vmem>>, vector<1x24x128xf32>,
    return
  }
  func.func @transform_0(%arg0: i32, %arg1: i32) -> (i32, i32, i32) {
    %c0_i32 = arith.constant 0 : i32
    %c0_i32_0 = arith.constant 0 : i32
    return %arg0, %c0_i32, %arg1 : i32, i32, i32
  }
  func.func @transform_1(%arg0: i32, %arg1: i32) -> (i32, i32) {
    %c0_i32 = arith.constant 0 : i32
    %c0_i32_0 = arith.constant 0 : i32
    return %c0_i32, %arg1 : i32, i32
  }
  func.func @transform_2(%arg0: i32, %arg1: i32) -> (i32, i32) {
    %c0_i32 = arith.constant 0 : i32
    %c0_i32_0 = arith.constant 0 : i32
    %c0_i32_1 = arith.constant 0 : i32
    return %c0_i32, %c0_i32_0 : i32, i32
  }
  func.func @transform_3(%arg0: i32, %arg1: i32) -> (i32, i32) {
    %c0_i32 = arith.constant 0 : i32
    %c0_i32_0 = arith.constant 0 : i32
    %c0_i32_1 = arith.constant 0 : i32
    return %c0_i32, %c0_i32_0 : i32, i32
  }
  func.func @transform_4(%arg0: i32, %arg1: i32) -> (i32, i32, i32) {
    %c0_i32 = arith.constant 0 : i32
    %c0_i32_0 = arith.constant 0 : i32
    return %arg0, %c0_i32, %arg1 : i32, i32, i32
  }
  func.func @transform_5(%arg0: i32, %arg1: i32) -> (i32, i32, i32) {
    %c0_i32 = arith.constant 0 : i32
    %c0_i32_0 = arith.constant 0 : i32
    return %arg0, %c0_i32, %arg1 : i32, i32, i32
  }
}

module attributes {stable_mosaic.version = 11 : i64} {
  func.func @_detect_level_kernel(%arg0: i32, %arg1: i32, %arg2: memref<1x64x128xbf16, #tpu.memory_space<vmem>>, %arg3: memref<2x128xf32, #tpu.memory_space<vmem>>, %arg4: memref<24x64xbf16, #tpu.memory_space<vmem>>, %arg5: memref<24x8xf32, #tpu.memory_space<vmem>>, %arg6: memref<1x24x128xf32, #tpu.memory_space<vmem>>, %arg7: memref<1x24x128xf32, #tpu.memory_space<vmem>>) attributes {dimension_semantics = [#tpu.dimension_semantics<parallel>, #tpu.dimension_semantics<parallel>], iteration_bounds = array<i64: 2, 1>, scalar_prefetch = 0 : i64, scratch_operands = 0 : i64, tpu.core_type = #tpu.core_type<tc>, window_params = [{transform_indices = @transform_0, window_bounds = array<i64: 1, 64, 128>}, {transform_indices = @transform_1, window_bounds = array<i64: 2, 128>}, {pipeline_mode = #tpu.pipeline_mode<synchronous>, transform_indices = @transform_2, window_bounds = array<i64: 24, 64>}, {pipeline_mode = #tpu.pipeline_mode<synchronous>, transform_indices = @transform_3, window_bounds = array<i64: 24, 8>}, {transform_indices = @transform_4, window_bounds = array<i64: 1, 24, 128>}, {transform_indices = @transform_5, window_bounds = array<i64: 1, 24, 128>}]} {
    %c0 = arith.constant 0 : index
    %c0_0 = arith.constant 0 : index
    %c0_1 = arith.constant 0 : index
    %0 = vector.load %arg2[%c0, %c0_0, %c0_1] : memref<1x64x128xbf16, #tpu.memory_space<vmem>>, vector<1x64x128xbf16>
    %1 = vector.shape_cast %0 : vector<1x64x128xbf16> to vector<64x128xbf16>
    %c0_2 = arith.constant 0 : index
    %c0_3 = arith.constant 0 : index
    %2 = vector.load %arg4[%c0_2, %c0_3] : memref<24x64xbf16, #tpu.memory_space<vmem>>, vector<24x64xbf16>
    %c0_4 = arith.constant 0 : index
    %c0_5 = arith.constant 0 : index
    %3 = vector.load %arg5[%c0_4, %c0_5] : memref<24x8xf32, #tpu.memory_space<vmem>>, vector<24x8xf32>
    %cst = arith.constant dense<0.000000e+00> : vector<24x128xf32>
    %4 = tpu.matmul %2, %1, %cst {dimension_numbers = #tpu.dot_dimension_numbers<[1], [0], [0], [1], [0, 0, 1, 1], [], []>} : vector<24x64xbf16>, vector<64x128xbf16>, vector<24x128xf32> -> vector<24x128xf32>
    %5 = vector.extract_strided_slice %3 {offsets = [0, 0], sizes = [24, 1], strides = [1, 1]} : vector<24x8xf32> to vector<24x1xf32>
    %6 = vector.broadcast %5 : vector<24x1xf32> to vector<24x128xf32>
    %7 = arith.addf %4, %6 : vector<24x128xf32>
    %c0_6 = arith.constant 0 : index
    %c0_7 = arith.constant 0 : index
    %c0_8 = arith.constant 0 : index
    %8 = vector.load %arg6[%c0_6, %c0_7, %c0_8] : memref<1x24x128xf32, #tpu.memory_space<vmem>>, vector<1x24x128xf32>
    %9 = vector.shape_cast %8 : vector<1x24x128xf32> to vector<24x128xf32>
    %10 = vector.shape_cast %7 : vector<24x128xf32> to vector<1x24x128xf32>
    tpu.vector_store %arg6[%c0_6, %c0_7, %c0_8], %10 {strides = array<i32>} : memref<1x24x128xf32, #tpu.memory_space<vmem>>, vector<1x24x128xf32>,
    %11 = arith.negf %7 : vector<24x128xf32>
    %12 = math.exp %11 : vector<24x128xf32>
    %cst_9 = arith.constant 1.000000e+00 : f32
    %13 = vector.broadcast %cst_9 : f32 to vector<24x128xf32>
    %14 = arith.addf %13, %12 : vector<24x128xf32>
    %15 = arith.divf %13, %14 : vector<24x128xf32>
    %c0_10 = arith.constant 0 : index
    %c0_11 = arith.constant 0 : index
    %16 = vector.load %arg3[%c0_10, %c0_11] : memref<2x128xf32, #tpu.memory_space<vmem>>, vector<1x128xf32>
    %c1 = arith.constant 1 : index
    %c0_12 = arith.constant 0 : index
    %17 = vector.load %arg3[%c1, %c0_12] : memref<2x128xf32, #tpu.memory_space<vmem>>, vector<1x128xf32>
    %18 = vector.extract_strided_slice %3 {offsets = [0, 2], sizes = [24, 1], strides = [1, 1]} : vector<24x8xf32> to vector<24x1xf32>
    %19 = vector.broadcast %18 : vector<24x1xf32> to vector<24x128xf32>
    %20 = vector.broadcast %16 : vector<1x128xf32> to vector<24x128xf32>
    %21 = arith.mulf %19, %20 : vector<24x128xf32>
    %22 = vector.extract_strided_slice %3 {offsets = [0, 3], sizes = [24, 1], strides = [1, 1]} : vector<24x8xf32> to vector<24x1xf32>
    %23 = vector.broadcast %22 : vector<24x1xf32> to vector<24x128xf32>
    %24 = vector.broadcast %17 : vector<1x128xf32> to vector<24x128xf32>
    %25 = arith.mulf %23, %24 : vector<24x128xf32>
    %26 = arith.addf %21, %25 : vector<24x128xf32>
    %cst_13 = arith.constant 2.000000e+00 : f32
    %27 = vector.broadcast %cst_13 : f32 to vector<24x128xf32>
    %28 = arith.mulf %15, %27 : vector<24x128xf32>
    %cst_14 = arith.constant 5.000000e-01 : f32
    %29 = vector.broadcast %cst_14 : f32 to vector<24x128xf32>
    %30 = arith.subf %28, %29 : vector<24x128xf32>
    %31 = arith.addf %30, %26 : vector<24x128xf32>
    %cst_15 = arith.constant 2.000000e+00 : f32
    %32 = vector.broadcast %cst_15 : f32 to vector<24x128xf32>
    %33 = arith.mulf %15, %32 : vector<24x128xf32>
    %34 = arith.mulf %33, %33 : vector<24x128xf32>
    %35 = vector.extract_strided_slice %3 {offsets = [0, 4], sizes = [24, 1], strides = [1, 1]} : vector<24x8xf32> to vector<24x1xf32>
    %36 = vector.broadcast %35 : vector<24x1xf32> to vector<24x128xf32>
    %37 = arith.mulf %36, %31 : vector<24x128xf32>
    %38 = vector.extract_strided_slice %3 {offsets = [0, 5], sizes = [24, 1], strides = [1, 1]} : vector<24x8xf32> to vector<24x1xf32>
    %39 = vector.broadcast %38 : vector<24x1xf32> to vector<24x128xf32>
    %40 = arith.mulf %39, %34 : vector<24x128xf32>
    %41 = arith.addf %37, %40 : vector<24x128xf32>
    %42 = vector.extract_strided_slice %3 {offsets = [0, 6], sizes = [24, 1], strides = [1, 1]} : vector<24x8xf32> to vector<24x1xf32>
    %43 = vector.broadcast %42 : vector<24x1xf32> to vector<24x128xf32>
    %44 = arith.mulf %43, %15 : vector<24x128xf32>
    %45 = arith.addf %41, %44 : vector<24x128xf32>
    %46 = vector.extract_strided_slice %3 {offsets = [0, 1], sizes = [24, 1], strides = [1, 1]} : vector<24x8xf32> to vector<24x1xf32>
    %47 = vector.broadcast %46 : vector<24x1xf32> to vector<24x128xf32>
    %48 = arith.mulf %45, %47 : vector<24x128xf32>
    %c0_16 = arith.constant 0 : index
    %c0_17 = arith.constant 0 : index
    %c0_18 = arith.constant 0 : index
    %49 = vector.load %arg7[%c0_16, %c0_17, %c0_18] : memref<1x24x128xf32, #tpu.memory_space<vmem>>, vector<1x24x128xf32>
    %50 = vector.shape_cast %49 : vector<1x24x128xf32> to vector<24x128xf32>
    %51 = vector.shape_cast %48 : vector<24x128xf32> to vector<1x24x128xf32>
    tpu.vector_store %arg7[%c0_16, %c0_17, %c0_18], %51 {strides = array<i32>} : memref<1x24x128xf32, #tpu.memory_space<vmem>>, vector<1x24x128xf32>,
    return
  }
  func.func @transform_0(%arg0: i32, %arg1: i32) -> (i32, i32, i32) {
    %c0_i32 = arith.constant 0 : i32
    %c0_i32_0 = arith.constant 0 : i32
    return %arg0, %c0_i32, %arg1 : i32, i32, i32
  }
  func.func @transform_1(%arg0: i32, %arg1: i32) -> (i32, i32) {
    %c0_i32 = arith.constant 0 : i32
    %c0_i32_0 = arith.constant 0 : i32
    return %c0_i32, %arg1 : i32, i32
  }
  func.func @transform_2(%arg0: i32, %arg1: i32) -> (i32, i32) {
    %c0_i32 = arith.constant 0 : i32
    %c0_i32_0 = arith.constant 0 : i32
    %c0_i32_1 = arith.constant 0 : i32
    return %c0_i32, %c0_i32_0 : i32, i32
  }
  func.func @transform_3(%arg0: i32, %arg1: i32) -> (i32, i32) {
    %c0_i32 = arith.constant 0 : i32
    %c0_i32_0 = arith.constant 0 : i32
    %c0_i32_1 = arith.constant 0 : i32
    return %c0_i32, %c0_i32_0 : i32, i32
  }
  func.func @transform_4(%arg0: i32, %arg1: i32) -> (i32, i32, i32) {
    %c0_i32 = arith.constant 0 : i32
    %c0_i32_0 = arith.constant 0 : i32
    return %arg0, %c0_i32, %arg1 : i32, i32, i32
  }
  func.func @transform_5(%arg0: i32, %arg1: i32) -> (i32, i32, i32) {
    %c0_i32 = arith.constant 0 : i32
    %c0_i32_0 = arith.constant 0 : i32
    return %arg0, %c0_i32, %arg1 : i32, i32, i32
  }
}

</mosaic_0001>

<bundles_post_ra>
// kernel: detect_forward.3
= control target key start
LH: loop header
LB: loop body
LE: loop exit
PB: predicated region body
PF: predicated region fallthrough
CT: control target
= control target key end

     0   :  { %s1018_s18 = smov 0   ;;  %s1020_s19 = smov 0   ;;  %s1266_s0 = inlined_call_operand.vmem [shape: bf16[2,16,256], index: 0, kind: input, shape index: {}]   ;;  %s1267_s1 = inlined_call_operand.vmem [shape: f32[2,256], index: 1, kind: input, shape index: {}]   ;;  %s1268_s2 = inlined_call_operand.vmem [shape: bf16[24,16], index: 2, kind: input, shape index: {}]   ;;  %s1269_s3 = inlined_call_operand.vmem [shape: f32[24,8], index: 3, kind: input, shape index: {}]   ;;  %s1270_s4 = inlined_call_operand.vmem [shape: f32[2,24,256], index: 4, kind: output, shape index: {0}]   ;;  %s1271_s5 = inlined_call_operand.vmem [shape: f32[2,24,256], index: 5, kind: output, shape index: {1}]  }
   0x1   :  { %s1022_s20 = smov 0  }
   0x2 LB: > { %s28_s21 = sadd.s32 1, %s975_s19  ;;  %p841_p0 = scmp.ge.s32.totalorder %s979_s20, 1  ;;  %s979_s20 = sphi %s1022_s20, %s16_s20   ;;  %s975_s19 = sphi %s1020_s19, %s1285_s19   ;;  %s971_s18 = sphi %s1018_s18, %s1284_s18  }
   0x3   : > { %p30_p1 = scmp.ge.s32.totalorder %s28_s21, 2  ;;  %p224_p2 = scmp.lt.s32.totalorder %s979_s20, 3 }
   0x5   : > { %s1287_s21 = smov (%p30_p1, %s28_s21), 0  ;;  %p225_p3 = pnand %p841_p0, %p224_p2 }
   0x6   : > { %p275_p4 = scmp.lt.s32.totalorder (!%p225_p3), %s971_s18, 1 }
   0x7   : > { %228 = sbr.rel (%p225_p3) target bundleno = 211 (0xd3), region = 36 }
   0xc   : > { %v1039_v0 = vld [vmem:[%s1269_s3 + $0x10] sm:$0xff]  ;;  %v1044_v1 = vld [vmem:[%s1269_s3] sm:$0xff]  ;;  %v981_v2 = vmov 0   ;;  %s1289_s18 = smov (!%p275_p4, %s971_s18), 1  ;;  %v315_v3 = vld [vmem:[%s1268_s2 + $0x8] sm:$0xf] }
   0xd   : > { %916 = vset.pattern.permute.xlu1 %v981_v2  ;;  %915 = vset.pattern.permute.xlu0 %v981_v2  ;;  %v317_v4 = vld [vmem:[%s1269_s3 + $0x8] sm:$0xff]  ;;  %v982_v5 = vmov 2   ;;  %s877_s30 = sshll.u32 %s1289_s18, 4  ;;  %v339_v6 = vunpack.c.l.b16 %v315_v3  ;;  %v880_v13 = vld [vmem:[%s1268_s2] sm:$0xff]  ;;  %vm352_vm0 = vcmask 130048   ;;  %v983_v15 = vmov 3  }
   0xe   : > { %331 = vperm.xlu1 %916, %v1039_v0   ;;  %321 = vperm.xlu0 %915, %v1044_v1   ;;  %s282_s8 = scalar_lea.vmem %s1266_s0, %s877_s30  ;;  %v984_v16 = vmov 4   ;;  %v985_v17 = vmov 6   ;;  %v986_v18 = vmov 5   ;;  %v987_v19 = vmov 1   ;;  %s883_s11 = smul.u32 48, %s1289_s18 }
   0xf   : > { %918 = vset.pattern.permute.xlu2 %v982_v5  ;;  %v852_v7 = vld [vmem:[%s282_s8] sm:$0xf]  ;;  %v879_v8 = vld [vmem:[%s282_s8 + $0x4] sm:$0xf0]  ;;  %v878_v9 = vld [vmem:[%s282_s8 + $0x4] sm:$0xf]  ;;  %v341_v14 = vpack.c.b16 %v339_v6, %v339_v6 }
  0x10   : > { %523 = vperm.xlu2 %918, %v317_v4   ;;  %v853_v10 = vor.u32 %v879_v8, %v852_v7  ;;  %v854_v11 = vld [vmem:[%s282_s8 + $0x8] sm:$0xf0]  ;;  %s1083_s14 = scalar_lea.vmem %s1270_s4, %s883_s11  ;;  %v515_v33 = vld [vmem:[%s1267_s1] ss:$2 sm:$0x3]  ;;  %s1225_s25 = scalar_lea.vmem %s1271_s5, %s883_s11 }
  0x11   : > { %v857_v12 = vor.u32 %v878_v9, %v854_v11  ;;  %v868_v34 = vld [vmem:[%s1267_s1 + $0x1] ss:$2 sm:$0x3]  ;;  %v531_v40 = vperm.slane %v515_v33, 0  ;;  %v1097_v45 = vperm.slane %v515_v33, 1 }
  0x12   : > { %366 = vmatpush.bf16.msra.mxu0 %v853_v10  ;;  %881 = vmatpush.bf16.msra.mxu2 %v853_v10  ;;  %v554_v46 = vperm.slane %v868_v34, 0  ;;  %v1100_v50 = vperm.slane %v868_v34, 1 }
  0x13   : > { %384 = vmatpush.bf16.msra.mxu1 %v857_v12  ;;  %882 = vmatpush.bf16.msra.mxu3 %v857_v12 }
  0x15   : > { %858 = vmatmul.msk.bf16.vlgmr.msra.gmra.mxu0 %vm352_vm0, %v880_v13  ;;  %859 = vmatmul.msk.bf16.vlgmr.msra.gmra.mxu2 %vm352_vm0, %v341_v14 }
  0x16   : > { %917 = vset.pattern.permute.xlu1 %v982_v5  ;;  %326 = vperm.xlu0 %915, %v317_v4  }
  0x17   : > { %519 = vperm.xlu1 %917, %v1044_v1   ;;  %860 = vmatmul.msk.bf16.vlgmr.msra.gmra.mxu1 %vm352_vm0, %v880_v13 }
  0x18   : > { %861 = vmatmul.msk.bf16.vlgmr.msra.gmra.mxu3 %vm352_vm0, %v341_v14  ;;  %527 = vperm.xlu2 %918, %v1039_v0  }
  0x1e   : > { %919 = vset.pattern.permute.xlu0 %v983_v15 }
  0x1f   : > { %920 = vset.pattern.permute.xlu1 %v983_v15  ;;  %542 = vperm.xlu0 %919, %v1044_v1  }
  0x20   : > { %546 = vperm.xlu1 %920, %v317_v4   ;;  %921 = vset.pattern.permute.xlu2 %v983_v15 }
  0x21   : > { %550 = vperm.xlu2 %921, %v1039_v0  }
  0x27   : > { %924 = vset.pattern.permute.xlu0 %v984_v16 }
  0x28   : > { %922 = vset.pattern.permute.xlu1 %v984_v16  ;;  %603 = vperm.xlu0 %924, %v1039_v0  }
  0x29   : > { %595 = vperm.xlu1 %922, %v1044_v1   ;;  %923 = vset.pattern.permute.xlu2 %v984_v16 }
  0x2a   : > { %599 = vperm.xlu2 %923, %v317_v4  }
  0x30   : > { %928 = vset.pattern.permute.xlu0 %v985_v17 }
  0x31   : > { %925 = vset.pattern.permute.xlu1 %v986_v18  ;;  %641 = vperm.xlu0 %928, %v317_v4  }
  0x32   : > { %613 = vperm.xlu1 %925, %v1044_v1   ;;  %926 = vset.pattern.permute.xlu2 %v986_v18 }
  0x33   : > { %617 = vperm.xlu2 %926, %v317_v4  }
  0x39   : > { %932 = vset.pattern.permute.xlu0 %v987_v19 }
  0x3a   : > { %621 = vperm.xlu1 %925, %v1039_v0  }
  0x3b   : > { %927 = vset.pattern.permute.xlu2 %v985_v17 }
  0x3c   : > { %637 = vperm.xlu2 %927, %v1044_v1  }
  0x42   : > { %929 = vset.pattern.permute.xlu1 %v985_v17 }
  0x43   : > { %645 = vperm.xlu1 %929, %v1039_v0  }
  0x44   : > { %930 = vset.pattern.permute.xlu2 %v987_v19 }
  0x45   : > { %661 = vperm.xlu2 %930, %v1044_v1  }
  0x4b   : > { %931 = vset.pattern.permute.xlu1 %v987_v19 }
  0x4c   : > { %665 = vperm.xlu1 %931, %v317_v4  }
  0x4d   : > { %669 = vperm.xlu2 %930, %v1039_v0  }
  0x6a   : > { %v1075_v20 = vpop.permute.xlu2 %523 }
  0x6b   : > { %v537_v7 = vmul.f32 %v531_v40, %v1075_v20 }
  0x72   : > { %v528_v22 = vpop.permute.xlu2 %527 }
  0x73   : > { %v539_v58 = vmul.f32 %v531_v40, %v528_v22  ;;  %v540_v59 = vmul.f32 %v1097_v45, %v528_v22 }
  0x7b   : > { %v551_v26 = vpop.permute.xlu2 %550 }
  0x7c   : > { %v562_v60 = vmul.f32 %v554_v46, %v551_v26  ;;  %v563_v61 = vmul.f32 %v1100_v50, %v551_v26 }
  0x7e   : > { %v1119_v8 = vadd.f32 %v562_v60, %v539_v58  ;;  %v1122_v11 = vadd.f32 %v563_v61, %v540_v59 }
  0x80   : > { %v332_v21 = vpop.permute.xlu1 %331  ;;  %v322_v23 = vpop.permute.xlu0 %321 }
  0x84   : > { %v1095_v44 = vpop.permute.xlu2 %599 }
  0x88   : > { %v327_v29 = vpop.permute.xlu0 %326 }
  0x89   : > { %v520_v24 = vpop.permute.xlu1 %519 }
  0x8a   : > { %v535_v62 = vmul.f32 %v531_v40, %v520_v24  ;;  %v536_v2 = vmul.f32 %v1097_v45, %v520_v24 }
  0x8d   : > { %v1129_v15 = vpop.permute.xlu2 %617 }
  0x91   : > { %v543_v53 = vpop.permute.xlu0 %542 }
  0x92   : > { %v368_v25 = vpop.f32.mrf.mxu0  ;;  %v1093_v35 = vpop.permute.xlu1 %546  ;;  %v558_v63 = vmul.f32 %v554_v46, %v543_v53  ;;  %v559_v4 = vmul.f32 %v1100_v50, %v543_v53 }
  0x93   : > { %v369_v27 = vadd.f32 %v368_v25, %v322_v23  ;;  %v560_v3 = vmul.f32 %v554_v46, %v1093_v35 }
  0x94   : > { %v386_v28 = vpop.f32.mrf.mxu1  ;;  %v1124_v12 = vadd.f32 %v558_v63, %v535_v62  ;;  %v1133_v18 = vadd.f32 %v559_v4, %v536_v2 }
  0x95   : > { %v387_v30 = vadd.f32 %v386_v28, %v322_v23  ;;  %395 = vst [vmem:[%s1083_s14] sm:$0xff] %v369_v27  ;;  %v862_v31 = vmul.f32 -1.442695, %v369_v27  ;;  %v1131_v17 = vadd.f32 %v560_v3, %v537_v7 }
  0x96   : > { %v638_v60 = vpop.permute.xlu2 %637 }
  0x97   : > { %396 = vst [vmem:[%s1083_s14 + $0x8] sm:$0xff] %v387_v30  ;;  %v863_v32 = vmul.f32 -1.442695, %v387_v30  ;;  %933 = vpow2.f32 %v862_v31 }
  0x98   : > { %v373_v36 = vpop.f32.mrf.mxu2 }
  0x99   : > { %935 = vpow2.f32 %v863_v32  ;;  %v374_v37 = vadd.f32 %v373_v36, %v332_v21 }
  0x9a   : > { %v370_v39 = vpop.f32.mrf.mxu0 }
  0x9b   : > { %v391_v38 = vpop.f32.mrf.mxu3  ;;  %v371_v42 = vadd.f32 %v370_v39, %v327_v29  ;;  %399 = vst [vmem:[%s1083_s14 + $0x20] sm:$0xff] %v374_v37  ;;  %v866_v47 = vmul.f32 -1.442695, %v374_v37  ;;  %v1113_v0 = vpop.permute.xlu1 %595 }
  0x9c   : > { %v392_v41 = vadd.f32 %v391_v38, %v332_v21  ;;  %v388_v43 = vpop.f32.mrf.mxu1 }
  0x9d   : > { %v389_v48 = vadd.f32 %v388_v43, %v327_v29  ;;  %v934_v49 = vpop.eup %933  ;;  %937 = vpow2.f32 %v866_v47  ;;  %397 = vst [vmem:[%s1083_s14 + $0x10] sm:$0xff] %v371_v42  ;;  %v864_v55 = vmul.f32 -1.442695, %v371_v42 }
  0x9e   : > { %400 = vst [vmem:[%s1083_s14 + $0x28] sm:$0xff] %v392_v41  ;;  %v867_v51 = vmul.f32 -1.442695, %v392_v41  ;;  %v1103_v54 = vadd.f32 1.0, %v934_v49 }
  0x9f   : > { %v936_v52 = vpop.eup %935  ;;  %398 = vst [vmem:[%s1083_s14 + $0x18] sm:$0xff] %v389_v48  ;;  %v865_v57 = vmul.f32 -1.442695, %v389_v48 }
  0xa0   : > { %v1106_v56 = vadd.f32 1.0, %v936_v52  ;;  %939 = vpow2.f32 %v867_v51  ;;  %v375_v1 = vpop.f32.mrf.mxu2  ;;  %v434_v9 = vand.u32 2147483647, %v1103_v54  ;;  %v436_v14 = vand.u32 2147483648, %v1103_v54  ;;  %v604_v52 = vpop.permute.xlu0 %603 }
  0xa1   : > { %941 = vrcp.f32 %v1103_v54  ;;  %vm430_vm1 = vweird.f32 %v1103_v54 }
  0xa2   : > { %943 = vrcp.f32 %v1106_v56  ;;  %vm445_vm2 = vweird.f32 %v1106_v56  ;;  %v449_v23 = vand.u32 2147483647, %v1106_v56  ;;  %vm1144_vm3 = vcmp.eq.f32.partialorder %v434_v9, 8.507059e+37 }
  0xa3   : > { %945 = vpow2.f32 %v864_v55  ;;  %v393_v5 = vpop.f32.mrf.mxu3  ;;  %v938_v6 = vpop.eup %937  ;;  %v451_v27 = vand.u32 2147483648, %v1106_v56  ;;  %v437_v30 = vor.u32 1.1754944e-38, %v436_v14 }
  0xa4   : > { %947 = vpow2.f32 %v865_v57  ;;  %v1126_v13 = vadd.f32 1.0, %v938_v6  ;;  %v1156_v38 = vpop.permute.xlu1 %613  ;;  %vm1160_vm6 = vcmp.eq.f32.partialorder %v449_v23, 8.507059e+37 }
  0xa5   : > { %v452_v47 = vor.u32 1.1754944e-38, %v451_v27 }
  0xa6   : > { %v940_v10 = vpop.eup %939  ;;  %949 = vrcp.f32 %v1126_v13  ;;  %v494_v34 = vand.u32 2147483647, %v1126_v13  ;;  %v496_v36 = vand.u32 2147483648, %v1126_v13  ;;  %vm490_vm7 = vweird.f32 %v1126_v13 }
  0xa7   : > { %v942_v16 = vpop.eup %941  ;;  %v1135_v19 = vadd.f32 1.0, %v940_v10 }
  0xa8   : > { %v944_v21 = vpop.eup %943  ;;  %v426_v22 = vmul.f32 %v942_v16, %v1103_v54  ;;  %vm431_vm4 = vweird.f32 %v942_v16  ;;  %vm1171_vm10 = vcmp.eq.f32.partialorder %v494_v34, 8.507059e+37  ;;  %v497_v53 = vor.u32 1.1754944e-38, %v496_v36 }
  0xa9   : > { %v946_v24 = vpop.eup %945  ;;  %v441_v25 = vmul.f32 %v944_v21, %v1106_v56  ;;  %951 = vrcp.f32 %v1135_v19  ;;  %v509_v39 = vand.u32 2147483647, %v1135_v19  ;;  %v511_v40 = vand.u32 2147483648, %v1135_v19  ;;  %vm432_vm9 = vmor %vm430_vm1, %vm431_vm4 }
  0xaa   : > { %v948_v28 = vpop.eup %947  ;;  %v427_v29 = vsub.f32 1.0, %v426_v22  ;;  %v1149_v31 = vadd.f32 1.0, %v946_v24  ;;  %vm446_vm5 = vweird.f32 %v944_v21  ;;  %vm505_vm8 = vweird.f32 %v1135_v19 }
  0xab   : > { %v442_v32 = vsub.f32 1.0, %v441_v25  ;;  %v1151_v33 = vadd.f32 1.0, %v948_v28  ;;  %vm447_vm11 = vmor %vm445_vm2, %vm446_vm5  ;;  %vm1180_vm12 = vcmp.eq.f32.partialorder %v509_v39, 8.507059e+37  ;;  %v512_v54 = vor.u32 1.1754944e-38, %v511_v40 }
  0xac   : > { %v428_v37 = vmul.f32 %v942_v16, %v427_v29  ;;  %953 = vrcp.f32 %v1149_v31  ;;  %v950_v43 = vpop.eup %949  ;;  %v466_v55 = vand.u32 2147483648, %v1149_v31  ;;  %v464_v61 = vand.u32 2147483647, %v1149_v31  ;;  %v622_v29 = vpop.permute.xlu1 %621 }
  0xad   : > { %v443_v41 = vmul.f32 %v944_v21, %v442_v32  ;;  %955 = vrcp.f32 %v1151_v33  ;;  %v486_v49 = vmul.f32 %v950_v43, %v1126_v13  ;;  %vm491_vm13 = vweird.f32 %v950_v43 }
  0xae   : > { %v429_v46 = vadd.f32 %v942_v16, %v428_v37  ;;  %vm460_vm15 = vweird.f32 %v1149_v31  ;;  %v467_v10 = vor.u32 1.1754944e-38, %v466_v55  ;;  %vm1193_vm0 = vcmp.eq.f32.partialorder %v464_v61, 8.507059e+37  ;;  %vm492_vm1 = vmor %vm490_vm7, %vm491_vm13 }
  0xaf   : > { %v952_v48 = vpop.eup %951  ;;  %v444_v51 = vadd.f32 %v944_v21, %v443_v41  ;;  %v487_v1 = vsub.f32 1.0, %v486_v49  ;;  %vm475_vm5 = vweird.f32 %v1151_v33 }
  0xb0   : > { %v501_v57 = vmul.f32 %v952_v48, %v1135_v19  ;;  %v433_v58 = vsel %vm432_vm9, %v942_v16, %v429_v46  ;;  %vm506_vm14 = vweird.f32 %v952_v48 }
  0xb1   : > { %v438_v62 = vsel %vm1144_vm3, %v437_v30, %v433_v58  ;;  %v448_v63 = vsel %vm447_vm11, %v944_v21, %v444_v51  ;;  %v488_v7 = vmul.f32 %v950_v43, %v487_v1  ;;  %vm507_vm3 = vmor %vm505_vm8, %vm506_vm14  ;;  %v662_v51 = vpop.permute.xlu2 %661 }
  0xb2   : > { %v954_v2 = vpop.eup %953  ;;  %v453_v3 = vsel %vm1160_vm6, %v452_v47, %v448_v63  ;;  %v570_v56 = vmul.f32 2.0, %v438_v62  ;;  %v502_v4 = vsub.f32 1.0, %v501_v57  ;;  %v648_v22 = vmul.f32 %v638_v60, %v438_v62 }
  0xb3   : > { %v1190_v5 = vpop.eup %955  ;;  %v571_v6 = vmul.f32 2.0, %v453_v3  ;;  %v456_v9 = vmul.f32 %v954_v2, %v1149_v31  ;;  %v489_v26 = vadd.f32 %v950_v43, %v488_v7  ;;  %vm461_vm2 = vweird.f32 %v954_v2 }
  0xb4   : > { %v869_v14 = vadd.f32 -0.5, %v570_v56  ;;  %v588_v16 = vmul.f32 %v570_v56, %v570_v56  ;;  %v503_v21 = vmul.f32 %v952_v48, %v502_v4  ;;  %v471_v32 = vmul.f32 %v1190_v5, %v1151_v33  ;;  %vm462_vm4 = vmor %vm460_vm15, %vm461_vm2 }
  0xb5   : > { %v870_v24 = vadd.f32 -0.5, %v571_v6  ;;  %v589_v25 = vmul.f32 %v571_v6, %v571_v6  ;;  %v457_v27 = vsub.f32 1.0, %v456_v9  ;;  %v493_v37 = vsel %vm492_vm1, %v950_v43, %v489_v26 }
  0xb6   : > { %v582_v28 = vadd.f32 %v869_v14, %v1124_v12  ;;  %v504_v30 = vadd.f32 %v952_v48, %v503_v21  ;;  %v624_v36 = vmul.f32 %v1156_v38, %v588_v16  ;;  %v498_v13 = vsel %vm1171_vm10, %v497_v53, %v493_v37 }
  0xb7   : > { %v583_v34 = vadd.f32 %v870_v24, %v1133_v18  ;;  %v458_v12 = vmul.f32 %v954_v2, %v457_v27  ;;  %v472_v41 = vsub.f32 1.0, %v471_v32  ;;  %v625_v46 = vmul.f32 %v1156_v38, %v589_v25 }
  0xb8   : > { %v606_v39 = vmul.f32 %v1113_v0, %v582_v28  ;;  %v508_v40 = vsel %vm507_vm3, %v952_v48, %v504_v30  ;;  %v574_v43 = vmul.f32 2.0, %v498_v13  ;;  %v649_v49 = vmul.f32 %v638_v60, %v453_v3 }
  0xb9   : > { %v607_v42 = vmul.f32 %v1113_v0, %v583_v34  ;;  %v513_v18 = vsel %vm1180_vm12, %v512_v54, %v508_v40  ;;  %v459_v55 = vadd.f32 %v954_v2, %v458_v12  ;;  %v473_v0 = vmul.f32 %v1190_v5, %v472_v41  ;;  %v670_v30 = vpop.permute.xlu2 %669 }
  0xba   : > { %v630_v47 = vadd.f32 %v624_v36, %v606_v39  ;;  %v575_v19 = vmul.f32 2.0, %v513_v18  ;;  %v592_v58 = vmul.f32 %v574_v43, %v574_v43  ;;  %v873_v53 = vadd.f32 -0.5, %v574_v43 }
  0xbb   : > { %v631_v57 = vadd.f32 %v625_v46, %v607_v42  ;;  %v463_v54 = vsel %vm462_vm4, %v954_v2, %v459_v55  ;;  %v646_v2 = vpop.permute.xlu1 %645  ;;  %vm476_vm6 = vweird.f32 %v1190_v5  ;;  %v479_v4 = vand.u32 2147483647, %v1151_v33 }
  0xbc   : > { %v593_v38 = vmul.f32 %v575_v19, %v575_v19  ;;  %v874_v48 = vadd.f32 -0.5, %v575_v19  ;;  %v654_v59 = vadd.f32 %v648_v22, %v630_v47  ;;  %v586_v61 = vadd.f32 %v873_v53, %v1119_v8  ;;  %vm1235_vm7 = vmor %vm475_vm5, %vm476_vm6 }
  0xbd   : > { %v655_v60 = vadd.f32 %v649_v49, %v631_v57  ;;  %v468_v31 = vsel %vm1193_vm0, %v467_v10, %v463_v54  ;;  %v628_v62 = vmul.f32 %v622_v29, %v592_v58  ;;  %v474_v8 = vadd.f32 %v1190_v5, %v473_v0 }
  0xbe   : > { %v587_v63 = vadd.f32 %v874_v48, %v1122_v11  ;;  %v672_v1 = vmul.f32 %v662_v51, %v654_v59  ;;  %v610_v3 = vmul.f32 %v604_v52, %v586_v61  ;;  %v629_v6 = vmul.f32 %v622_v29, %v593_v38 }
  0xbf   : > { %v673_v56 = vmul.f32 %v662_v51, %v655_v60  ;;  %v481_v10 = vand.u32 2147483648, %v1151_v33  ;;  %v572_v11 = vmul.f32 2.0, %v468_v31  ;;  %v652_v16 = vmul.f32 %v646_v2, %v498_v13 }
  0xc0   : > { %v611_v7 = vmul.f32 %v604_v52, %v587_v63  ;;  %678 = vst [vmem:[%s1225_s25] sm:$0xff] %v672_v1  ;;  %v634_v14 = vadd.f32 %v628_v62, %v610_v3  ;;  %v653_v21 = vmul.f32 %v646_v2, %v513_v18  ;;  %v478_v22 = vsel %vm1235_vm7, %v1190_v5, %v474_v8  ;;  %v642_v5 = vpop.permute.xlu0 %641 }
  0xc1   : > { %679 = vst [vmem:[%s1225_s25 + $0x8] sm:$0xff] %v673_v56  ;;  %v482_v24 = vor.u32 1.1754944e-38, %v481_v10  ;;  %v871_v25 = vadd.f32 -0.5, %v572_v11  ;;  %v590_v26 = vmul.f32 %v572_v11, %v572_v11  ;;  %v561_v27 = vmul.f32 %v1100_v50, %v1093_v35 }
  0xc2   : > { %v635_v23 = vadd.f32 %v629_v6, %v611_v7  ;;  %vm480_vm8 = vcmp.eq.f32.partialorder %v479_v4, 8.507059e+37  ;;  %v658_v28 = vadd.f32 %v652_v16, %v634_v14  ;;  %v538_v34 = vmul.f32 %v1097_v45, %v1075_v20 }
  0xc3   : > { %v483_v33 = vsel %vm480_vm8, %v482_v24, %v478_v22  ;;  %v584_v29 = vadd.f32 %v871_v25, %v1131_v17  ;;  %v626_v35 = vmul.f32 %v1129_v15, %v590_v26  ;;  %v650_v17 = vmul.f32 %v642_v5, %v468_v31  ;;  %v666_v46 = vpop.permute.xlu1 %665 }
  0xc4   : > { %v659_v32 = vadd.f32 %v653_v21, %v635_v23  ;;  %v573_v36 = vmul.f32 2.0, %v483_v33  ;;  %v676_v37 = vmul.f32 %v670_v30, %v658_v28  ;;  %v567_v50 = vadd.f32 %v561_v27, %v538_v34 }
  0xc5   : > { %v608_v39 = vmul.f32 %v1095_v44, %v584_v29  ;;  %v651_v47 = vmul.f32 %v642_v5, %v483_v33 }
  0xc6   : > { %v677_v12 = vmul.f32 %v670_v30, %v659_v32  ;;  %v872_v13 = vadd.f32 -0.5, %v573_v36  ;;  %v591_v40 = vmul.f32 %v573_v36, %v573_v36  ;;  %682 = vst [vmem:[%s1225_s25 + $0x20] sm:$0xff] %v676_v37 }
  0xc7   : > { %v632_v41 = vadd.f32 %v626_v35, %v608_v39 }
  0xc8   : > { %683 = vst [vmem:[%s1225_s25 + $0x28] sm:$0xff] %v677_v12  ;;  %v585_v42 = vadd.f32 %v872_v13, %v567_v50  ;;  %v627_v18 = vmul.f32 %v1129_v15, %v591_v40 }
  0xc9   : > { %v656_v20 = vadd.f32 %v650_v17, %v632_v41 }
  0xca   : > { %v609_v45 = vmul.f32 %v1095_v44, %v585_v42 }
  0xcb   : > { %v674_v43 = vmul.f32 %v666_v46, %v656_v20 }
  0xcc   : > { %v633_v19 = vadd.f32 %v627_v18, %v609_v45 }
  0xcd   : > { %680 = vst [vmem:[%s1225_s25 + $0x10] sm:$0xff] %v674_v43 }
  0xce   : > { %v657_v49 = vadd.f32 %v651_v47, %v633_v19 }
  0xd0   : > { %v675_v51 = vmul.f32 %v666_v46, %v657_v49 }
  0xd2   : > { %681 = vst [vmem:[%s1225_s25 + $0x18] sm:$0xff] %v675_v51 }
  0xd3 PF: > { %s16_s20 = sadd.s32 1, %s979_s20   ;;  %s1284_s18 = smov %s975_s19 }
  0xd4   : > { %p13_p5 = scmp.ge.s32.totalorder %s16_s20, 4   ;;  %s1285_s19 = smov %s1287_s21 }
  0xd6   :  { %15 = sbr.rel (!%p13_p5) target bundleno = 2 (0x2), region = 82 }

// kernel: detect_forward.4
= control target key start
LH: loop header
LB: loop body
LE: loop exit
PB: predicated region body
PF: predicated region fallthrough
CT: control target
= control target key end

     0   :  { %s852_s18 = smov 0   ;;  %s854_s19 = smov 0   ;;  %s959_s0 = inlined_call_operand.vmem [shape: bf16[2,32,128], index: 0, kind: input, shape index: {}]   ;;  %s960_s1 = inlined_call_operand.vmem [shape: f32[2,128], index: 1, kind: input, shape index: {}]   ;;  %s961_s2 = inlined_call_operand.vmem [shape: bf16[24,32], index: 2, kind: input, shape index: {}]   ;;  %s962_s3 = inlined_call_operand.vmem [shape: f32[24,8], index: 3, kind: input, shape index: {}]   ;;  %s963_s4 = inlined_call_operand.vmem [shape: f32[2,24,128], index: 4, kind: output, shape index: {0}]   ;;  %s964_s5 = inlined_call_operand.vmem [shape: f32[2,24,128], index: 5, kind: output, shape index: {1}]  }
   0x1   :  { %s856_s20 = smov 0  }
   0x2 LB: > { %s28_s21 = sadd.s32 1, %s809_s19  ;;  %p694_p0 = scmp.ge.s32.totalorder %s813_s20, 1  ;;  %s813_s20 = sphi %s856_s20, %s16_s20   ;;  %s809_s19 = sphi %s854_s19, %s966_s19   ;;  %s805_s18 = sphi %s852_s18, %s965_s18  }
   0x3   : > { %p30_p1 = scmp.ge.s32.totalorder %s28_s21, 2  ;;  %p220_p2 = scmp.lt.s32.totalorder %s813_s20, 3 }
   0x5   : > { %s968_s21 = smov (%p30_p1, %s28_s21), 0  ;;  %p221_p3 = pnand %p694_p0, %p220_p2 }
   0x6   : > { %p266_p4 = scmp.lt.s32.totalorder (!%p221_p3), %s805_s18, 1 }
   0x7   : > { %224 = sbr.rel (%p221_p3) target bundleno = 202 (0xca), region = 36 }
   0xc   : > { %v873_v0 = vld [vmem:[%s962_s3 + $0x10] sm:$0xff]  ;;  %v302_v1 = vld [vmem:[%s962_s3] sm:$0xff]  ;;  %v815_v2 = vmov 0   ;;  %s970_s18 = smov (!%p266_p4, %s805_s18), 1  ;;  %v303_v3 = vld [vmem:[%s962_s3 + $0x8] sm:$0xff]  ;;  %v816_v4 = vmov 2  }
   0xd   : > { %760 = vset.pattern.permute.xlu1 %v815_v2  ;;  %759 = vset.pattern.permute.xlu0 %v815_v2  ;;  %s721_s28 = sshll.u32 %s970_s18, 4  ;;  %v301_v5 = vld [vmem:[%s961_s2 + $0x8] sm:$0xf]  ;;  %v724_v9 = vld [vmem:[%s961_s2] sm:$0xff]  ;;  %vm340_vm0 = vcmask 261120   ;;  %v817_v11 = vmov 3  }
   0xe   : > { %317 = vperm.xlu1 %760, %v873_v0   ;;  %307 = vperm.xlu0 %759, %v302_v1   ;;  %s273_s8 = scalar_lea.vmem %s959_s0, %s721_s28  ;;  %v325_v7 = vunpack.c.l.b16 %v301_v5  ;;  %v818_v12 = vmov 4   ;;  %v819_v13 = vmov 6   ;;  %v820_v14 = vmov 5   ;;  %s727_s11 = smul.u32 24, %s970_s18  ;;  %v777_v51 = vld [vmem:[%s960_s1] ss:$0 sm:$0xff] }
   0xf   : > { %762 = vset.pattern.permute.xlu2 %v816_v4  ;;  %v723_v6 = vld [vmem:[%s273_s8 + $0x8] sm:$0xff]  ;;  %v722_v8 = vld [vmem:[%s273_s8] sm:$0xff]  ;;  %v821_v15 = vmov 1  }
  0x10   : > { %432 = vperm.xlu2 %762, %v303_v3   ;;  %353 = vmatpush.bf16.msra.mxu0 %v723_v6  ;;  %v327_v10 = vpack.c.b16 %v325_v7, %v325_v7  ;;  %s285_s14 = scalar_lea.vmem %s963_s4, %s727_s11  ;;  %v778_v52 = vld [vmem:[%s960_s1 + $0x1] ss:$0 sm:$0xff]  ;;  %s293_s25 = scalar_lea.vmem %s964_s5, %s727_s11 }
  0x11   : > { %725 = vmatpush.bf16.msra.mxu1 %v723_v6 }
  0x14   : > { %354 = vmatpush.bf16.msra.mxu0 %v722_v8 }
  0x15   : > { %726 = vmatpush.bf16.msra.mxu1 %v722_v8 }
  0x16   : > { %761 = vset.pattern.permute.xlu1 %v816_v4  ;;  %312 = vperm.xlu0 %759, %v303_v3  }
  0x17   : > { %428 = vperm.xlu1 %761, %v302_v1   ;;  %711 = vmatmul.msk.bf16.vlgmr.msra.gmra.mxu0 %vm340_vm0, %v724_v9 }
  0x18   : > { %436 = vperm.xlu2 %762, %v873_v0   ;;  %712 = vmatmul.msk.bf16.vlgmr.msra.gmra.mxu1 %vm340_vm0, %v327_v10 }
  0x1e   : > { %763 = vset.pattern.permute.xlu0 %v817_v11 }
  0x1f   : > { %764 = vset.pattern.permute.xlu1 %v817_v11  ;;  %444 = vperm.xlu0 %763, %v302_v1  }
  0x20   : > { %448 = vperm.xlu1 %764, %v303_v3   ;;  %765 = vset.pattern.permute.xlu2 %v817_v11 }
  0x21   : > { %452 = vperm.xlu2 %765, %v873_v0  }
  0x27   : > { %768 = vset.pattern.permute.xlu0 %v818_v12 }
  0x28   : > { %766 = vset.pattern.permute.xlu1 %v818_v12  ;;  %483 = vperm.xlu0 %768, %v873_v0  }
  0x29   : > { %475 = vperm.xlu1 %766, %v302_v1   ;;  %767 = vset.pattern.permute.xlu2 %v818_v12 }
  0x2a   : > { %479 = vperm.xlu2 %767, %v303_v3  }
  0x30   : > { %772 = vset.pattern.permute.xlu0 %v819_v13 }
  0x31   : > { %769 = vset.pattern.permute.xlu1 %v820_v14  ;;  %512 = vperm.xlu0 %772, %v303_v3  }
  0x32   : > { %490 = vperm.xlu1 %769, %v302_v1   ;;  %770 = vset.pattern.permute.xlu2 %v820_v14 }
  0x33   : > { %494 = vperm.xlu2 %770, %v303_v3  }
  0x39   : > { %776 = vset.pattern.permute.xlu0 %v821_v15 }
  0x3a   : > { %498 = vperm.xlu1 %769, %v873_v0  }
  0x3b   : > { %771 = vset.pattern.permute.xlu2 %v819_v13 }
  0x3c   : > { %508 = vperm.xlu2 %771, %v302_v1  }
  0x42   : > { %773 = vset.pattern.permute.xlu1 %v819_v13 }
  0x43   : > { %516 = vperm.xlu1 %773, %v873_v0  }
  0x44   : > { %774 = vset.pattern.permute.xlu2 %v821_v15 }
  0x45   : > { %526 = vperm.xlu2 %774, %v302_v1  }
  0x4b   : > { %775 = vset.pattern.permute.xlu1 %v821_v15 }
  0x4c   : > { %530 = vperm.xlu1 %775, %v303_v3  }
  0x4d   : > { %534 = vperm.xlu2 %774, %v873_v0  }
  0x6a   : > { %v900_v16 = vpop.permute.xlu2 %432 }
  0x72   : > { %v437_v18 = vpop.permute.xlu2 %436 }
  0x73   : > { %v442_v0 = vmul.f32 %v777_v51, %v437_v18 }
  0x7b   : > { %v902_v20 = vpop.permute.xlu2 %452 }
  0x7c   : > { %v458_v6 = vmul.f32 %v778_v52, %v902_v20 }
  0x80   : > { %v318_v17 = vpop.permute.xlu1 %317  ;;  %v308_v21 = vpop.permute.xlu0 %307 }
  0x84   : > { %v912_v29 = vpop.permute.xlu2 %479 }
  0x88   : > { %v313_v30 = vpop.permute.xlu0 %312 }
  0x89   : > { %v429_v19 = vpop.permute.xlu1 %428 }
  0x8a   : > { %v440_v57 = vmul.f32 %v777_v51, %v429_v19 }
  0x8d   : > { %v916_v40 = vpop.permute.xlu2 %494 }
  0x91   : > { %v445_v47 = vpop.permute.xlu0 %444 }
  0x92   : > { %v910_v24 = vpop.permute.xlu1 %448  ;;  %v456_v58 = vmul.f32 %v778_v52, %v445_v47 }
  0x94   : > { %v356_v22 = vpop.f32.mrf.mxu0  ;;  %v459_v7 = vadd.f32 %v456_v58, %v440_v57 }
  0x95   : > { %v361_v23 = vpop.f32.mrf.mxu1  ;;  %v357_v25 = vadd.f32 %v356_v22, %v308_v21 }
  0x96   : > { %v362_v26 = vadd.f32 %v361_v23, %v318_v17  ;;  %v923_v50 = vpop.permute.xlu2 %508  ;;  %v461_v23 = vadd.f32 %v458_v6, %v442_v0 }
  0x97   : > { %365 = vst [vmem:[%s285_s14] sm:$0xff] %v357_v25  ;;  %v713_v27 = vmul.f32 -1.442695, %v357_v25 }
  0x98   : > { %v715_v28 = vmul.f32 -1.442695, %v362_v26  ;;  %367 = vst [vmem:[%s285_s14 + $0x10] sm:$0xff] %v362_v26 }
  0x99   : > { %779 = vpow2.f32 %v713_v27  ;;  %v457_v27 = vmul.f32 %v778_v52, %v910_v24 }
  0x9a   : > { %781 = vpow2.f32 %v715_v28  ;;  %v484_v22 = vpop.permute.xlu0 %483 }
  0x9b   : > { %v914_v33 = vpop.permute.xlu1 %475 }
  0x9c   : > { %v358_v31 = vpop.f32.mrf.mxu0 }
  0x9d   : > { %v363_v32 = vpop.f32.mrf.mxu1  ;;  %v359_v34 = vadd.f32 %v358_v31, %v313_v30 }
  0x9f   : > { %v780_v35 = vpop.eup %779  ;;  %366 = vst [vmem:[%s285_s14 + $0x8] sm:$0xff] %v359_v34  ;;  %v714_v36 = vmul.f32 -1.442695, %v359_v34  ;;  %v527_v20 = vpop.permute.xlu2 %526 }
  0xa0   : > { %v782_v37 = vpop.eup %781  ;;  %v377_v38 = vadd.f32 1.0, %v780_v35 }
  0xa1   : > { %v379_v39 = vadd.f32 1.0, %v782_v37  ;;  %783 = vpow2.f32 %v714_v36 }
  0xa2   : > { %785 = vrcp.f32 %v377_v38  ;;  %v391_v53 = vand.u32 2147483648, %v377_v38  ;;  %v389_v55 = vand.u32 2147483647, %v377_v38  ;;  %vm385_vm2 = vweird.f32 %v377_v38 }
  0xa3   : > { %787 = vrcp.f32 %v379_v39  ;;  %v421_v59 = vand.u32 2147483648, %v379_v39  ;;  %v419_v62 = vand.u32 2147483647, %v379_v39  ;;  %vm415_vm5 = vweird.f32 %v379_v39 }
  0xa4   : > { %v918_v42 = vpop.permute.xlu1 %490  ;;  %v392_v1 = vor.u32 1.1754944e-38, %v391_v53  ;;  %vm390_vm6 = vcmp.eq.f32.partialorder %v389_v55, 8.507059e+37  ;;  %v513_v53 = vpop.permute.xlu0 %512 }
  0xa5   : > { %v422_v9 = vor.u32 1.1754944e-38, %v421_v59  ;;  %vm420_vm8 = vcmp.eq.f32.partialorder %v419_v62, 8.507059e+37 }
  0xa7   : > { %v784_v41 = vpop.eup %783 }
  0xa8   : > { %v786_v43 = vpop.eup %785  ;;  %v920_v44 = vadd.f32 1.0, %v784_v41 }
  0xa9   : > { %v788_v45 = vpop.eup %787  ;;  %v381_v46 = vmul.f32 %v786_v43, %v377_v38  ;;  %vm386_vm1 = vweird.f32 %v786_v43  ;;  %v441_v38 = vmul.f32 %v777_v51, %v900_v16  ;;  %v535_v51 = vpop.permute.xlu2 %534 }
  0xaa   : > { %789 = vrcp.f32 %v920_v44  ;;  %v411_v49 = vmul.f32 %v788_v45, %v379_v39  ;;  %vm416_vm3 = vweird.f32 %v788_v45  ;;  %vm387_vm4 = vmor %vm385_vm2, %vm386_vm1  ;;  %v404_v13 = vand.u32 2147483647, %v920_v44 }
  0xab   : > { %v382_v48 = vsub.f32 1.0, %v381_v46  ;;  %vm417_vm7 = vmor %vm415_vm5, %vm416_vm3  ;;  %v406_v14 = vand.u32 2147483648, %v920_v44  ;;  %vm400_vm10 = vweird.f32 %v920_v44  ;;  %v460_v46 = vadd.f32 %v457_v27, %v441_v38 }
  0xac   : > { %v412_v56 = vsub.f32 1.0, %v411_v49  ;;  %v499_v4 = vpop.permute.xlu1 %498  ;;  %vm405_vm12 = vcmp.eq.f32.partialorder %v404_v13, 8.507059e+37 }
  0xad   : > { %v383_v54 = vmul.f32 %v786_v43, %v382_v48  ;;  %v407_v28 = vor.u32 1.1754944e-38, %v406_v14 }
  0xae   : > { %v413_v61 = vmul.f32 %v788_v45, %v412_v56 }
  0xaf   : > { %v384_v60 = vadd.f32 %v786_v43, %v383_v54 }
  0xb0   : > { %v790_v63 = vpop.eup %789  ;;  %v414_v5 = vadd.f32 %v788_v45, %v413_v61 }
  0xb1   : > { %v388_v2 = vsel %vm387_vm4, %v786_v43, %v384_v60  ;;  %v396_v3 = vmul.f32 %v790_v63, %v920_v44  ;;  %vm401_vm9 = vweird.f32 %v790_v63 }
  0xb2   : > { %v393_v8 = vsel %vm390_vm6, %v392_v1, %v388_v2  ;;  %v418_v12 = vsel %vm417_vm7, %v788_v45, %v414_v5  ;;  %vm402_vm11 = vmor %vm400_vm10, %vm401_vm9 }
  0xb3   : > { %v462_v10 = vmul.f32 2.0, %v393_v8  ;;  %v397_v11 = vsub.f32 1.0, %v396_v3  ;;  %v423_v15 = vsel %vm420_vm8, %v422_v9, %v418_v12  ;;  %v519_v24 = vmul.f32 %v923_v50, %v393_v8 }
  0xb4   : > { %v464_v21 = vmul.f32 2.0, %v423_v15 }
  0xb5   : > { %v716_v17 = vadd.f32 -0.5, %v462_v10  ;;  %v398_v18 = vmul.f32 %v790_v63, %v397_v11  ;;  %v471_v19 = vmul.f32 %v462_v10, %v462_v10  ;;  %v517_v43 = vpop.permute.xlu1 %516 }
  0xb6   : > { %v473_v30 = vmul.f32 %v464_v21, %v464_v21  ;;  %v718_v31 = vadd.f32 -0.5, %v464_v21  ;;  %v521_v49 = vmul.f32 %v517_v43, %v423_v15 }
  0xb7   : > { %v468_v25 = vadd.f32 %v716_v17, %v459_v7  ;;  %v399_v26 = vadd.f32 %v790_v63, %v398_v18  ;;  %v501_v35 = vmul.f32 %v918_v42, %v471_v19 }
  0xb8   : > { %v470_v37 = vadd.f32 %v718_v31, %v461_v23  ;;  %v503_v44 = vmul.f32 %v499_v4, %v473_v30 }
  0xb9   : > { %v486_v32 = vmul.f32 %v914_v33, %v468_v25  ;;  %v403_v34 = vsel %vm402_vm11, %v790_v63, %v399_v26 }
  0xba   : > { %v408_v36 = vsel %vm405_vm12, %v407_v28, %v403_v34  ;;  %v488_v45 = vmul.f32 %v484_v22, %v470_v37 }
  0xbb   : > { %v463_v39 = vmul.f32 2.0, %v408_v36  ;;  %v504_v41 = vadd.f32 %v501_v35, %v486_v32  ;;  %v520_v58 = vmul.f32 %v513_v53, %v408_v36 }
  0xbc   : > { %v506_v52 = vadd.f32 %v503_v44, %v488_v45 }
  0xbd   : > { %v717_v47 = vadd.f32 -0.5, %v463_v39  ;;  %v472_v48 = vmul.f32 %v463_v39, %v463_v39  ;;  %v522_v33 = vadd.f32 %v519_v24, %v504_v41 }
  0xbe   : > { %v524_v54 = vadd.f32 %v521_v49, %v506_v52  ;;  %v531_v59 = vpop.permute.xlu1 %530 }
  0xbf   : > { %v469_v42 = vadd.f32 %v717_v47, %v460_v46  ;;  %v537_v16 = vmul.f32 %v527_v20, %v522_v33  ;;  %v502_v55 = vmul.f32 %v916_v40, %v472_v48 }
  0xc0   : > { %v539_v56 = vmul.f32 %v535_v51, %v524_v54 }
  0xc1   : > { %v487_v50 = vmul.f32 %v912_v29, %v469_v42  ;;  %540 = vst [vmem:[%s293_s25] sm:$0xff] %v537_v16 }
  0xc2   : > { %542 = vst [vmem:[%s293_s25 + $0x10] sm:$0xff] %v539_v56 }
  0xc3   : > { %v505_v57 = vadd.f32 %v502_v55, %v487_v50 }
  0xc5   : > { %v523_v60 = vadd.f32 %v520_v58, %v505_v57 }
  0xc7   : > { %v538_v61 = vmul.f32 %v531_v59, %v523_v60 }
  0xc9   : > { %541 = vst [vmem:[%s293_s25 + $0x8] sm:$0xff] %v538_v61 }
  0xca PF: > { %s16_s20 = sadd.s32 1, %s813_s20   ;;  %s965_s18 = smov %s809_s19 }
  0xcb   : > { %p13_p5 = scmp.ge.s32.totalorder %s16_s20, 4   ;;  %s966_s19 = smov %s968_s21 }
  0xcd   :  { %15 = sbr.rel (!%p13_p5) target bundleno = 2 (0x2), region = 81 }

// kernel: detect_forward.5
= control target key start
LH: loop header
LB: loop body
LE: loop exit
PB: predicated region body
PF: predicated region fallthrough
CT: control target
= control target key end

     0   :  { %s880_s18 = smov 0   ;;  %s882_s19 = smov 0   ;;  %s996_s0 = inlined_call_operand.vmem [shape: bf16[2,64,128], index: 0, kind: input, shape index: {}]   ;;  %s997_s1 = inlined_call_operand.vmem [shape: f32[2,128], index: 1, kind: input, shape index: {}]   ;;  %s998_s2 = inlined_call_operand.vmem [shape: bf16[24,64], index: 2, kind: input, shape index: {}]   ;;  %s999_s3 = inlined_call_operand.vmem [shape: f32[24,8], index: 3, kind: input, shape index: {}]   ;;  %s1000_s4 = inlined_call_operand.vmem [shape: f32[2,24,128], index: 4, kind: output, shape index: {0}]   ;;  %s1001_s5 = inlined_call_operand.vmem [shape: f32[2,24,128], index: 5, kind: output, shape index: {1}]  }
   0x1   :  { %s884_s20 = smov 0  }
   0x2 LB: > { %s28_s21 = sadd.s32 1, %s837_s19  ;;  %p710_p0 = scmp.ge.s32.totalorder %s841_s20, 1  ;;  %s841_s20 = sphi %s884_s20, %s16_s20   ;;  %s837_s19 = sphi %s882_s19, %s1003_s19   ;;  %s833_s18 = sphi %s880_s18, %s1002_s18  }
   0x3   : > { %p30_p1 = scmp.ge.s32.totalorder %s28_s21, 2  ;;  %p220_p2 = scmp.lt.s32.totalorder %s841_s20, 3 }
   0x5   : > { %s1005_s21 = smov (%p30_p1, %s28_s21), 0  ;;  %p221_p3 = pnand %p710_p0, %p220_p2 }
   0x6   : > { %p266_p4 = scmp.lt.s32.totalorder (!%p221_p3), %s833_s18, 1 }
   0x7   : > { %224 = sbr.rel (%p221_p3) target bundleno = 212 (0xd4), region = 36 }
   0xc   : > { %v901_v0 = vld [vmem:[%s999_s3 + $0x10] sm:$0xff]  ;;  %v906_v1 = vld [vmem:[%s999_s3] sm:$0xff]  ;;  %v843_v2 = vmov 0   ;;  %s1007_s18 = smov (!%p266_p4, %s833_s18), 1  ;;  %v307_v3 = vld [vmem:[%s999_s3 + $0x8] sm:$0xff]  ;;  %v844_v4 = vmov 2  }
   0xd   : > { %788 = vset.pattern.permute.xlu1 %v843_v2  ;;  %787 = vset.pattern.permute.xlu0 %v843_v2  ;;  %s745_s28 = sshll.u32 %s1007_s18, 5  ;;  %v305_v8 = vld [vmem:[%s998_s2 + $0x8] sm:$0xf]  ;;  %v845_v11 = vmov 3   ;;  %v750_v12 = vld [vmem:[%s998_s2] sm:$0xff]  ;;  %vm356_vm0 = vcmask 523264  }
   0xe   : > { %321 = vperm.xlu1 %788, %v901_v0   ;;  %311 = vperm.xlu0 %787, %v906_v1   ;;  %s273_s6 = scalar_lea.vmem %s996_s0, %s745_s28  ;;  %v329_v9 = vunpack.c.l.b16 %v305_v8  ;;  %v846_v14 = vmov 4   ;;  %v847_v15 = vmov 6   ;;  %v848_v16 = vmov 5   ;;  %s755_s11 = smul.u32 24, %s1007_s18  ;;  %v805_v53 = vld [vmem:[%s997_s1] ss:$0 sm:$0xff] }
   0xf   : > { %790 = vset.pattern.permute.xlu2 %v844_v4  ;;  %v749_v5 = vld [vmem:[%s273_s6 + $0x18] sm:$0xff]  ;;  %v748_v6 = vld [vmem:[%s273_s6 + $0x10] sm:$0xff]  ;;  %v747_v7 = vld [vmem:[%s273_s6 + $0x8] sm:$0xff]  ;;  %v849_v17 = vmov 1  }
  0x10   : > { %448 = vperm.xlu2 %790, %v307_v3   ;;  %367 = vmatpush.bf16.msra.mxu0 %v749_v5  ;;  %v746_v10 = vld [vmem:[%s273_s6] sm:$0xff]  ;;  %v331_v13 = vpack.c.b16 %v329_v9, %v329_v9  ;;  %s285_s14 = scalar_lea.vmem %s1000_s4, %s755_s11  ;;  %s293_s25 = scalar_lea.vmem %s1001_s5, %s755_s11 }
  0x11   : > { %751 = vmatpush.bf16.msra.mxu1 %v749_v5  ;;  %v806_v54 = vld [vmem:[%s997_s1 + $0x1] ss:$0 sm:$0xff] }
  0x14   : > { %368 = vmatpush.bf16.msra.mxu0 %v748_v6 }
  0x15   : > { %752 = vmatpush.bf16.msra.mxu1 %v748_v6 }
  0x16   : > { %789 = vset.pattern.permute.xlu1 %v844_v4  ;;  %316 = vperm.xlu0 %787, %v307_v3  }
  0x17   : > { %444 = vperm.xlu1 %789, %v906_v1  }
  0x18   : > { %452 = vperm.xlu2 %790, %v901_v0   ;;  %369 = vmatpush.bf16.msra.mxu0 %v747_v7 }
  0x19   : > { %753 = vmatpush.bf16.msra.mxu1 %v747_v7 }
  0x1c   : > { %370 = vmatpush.bf16.msra.mxu0 %v746_v10 }
  0x1d   : > { %754 = vmatpush.bf16.msra.mxu1 %v746_v10 }
  0x1e   : > { %791 = vset.pattern.permute.xlu0 %v845_v11 }
  0x1f   : > { %792 = vset.pattern.permute.xlu1 %v845_v11  ;;  %460 = vperm.xlu0 %791, %v906_v1  }
  0x20   : > { %464 = vperm.xlu1 %792, %v307_v3   ;;  %793 = vset.pattern.permute.xlu2 %v845_v11 }
  0x21   : > { %468 = vperm.xlu2 %793, %v901_v0   ;;  %735 = vmatmul.msk.bf16.vlgmr.msra.gmra.mxu0 %vm356_vm0, %v750_v12 }
  0x22   : > { %736 = vmatmul.msk.bf16.vlgmr.msra.gmra.mxu1 %vm356_vm0, %v331_v13 }
  0x27   : > { %796 = vset.pattern.permute.xlu0 %v846_v14 }
  0x28   : > { %499 = vperm.xlu0 %796, %v901_v0   ;;  %794 = vset.pattern.permute.xlu1 %v846_v14 }
  0x29   : > { %491 = vperm.xlu1 %794, %v906_v1   ;;  %795 = vset.pattern.permute.xlu2 %v846_v14 }
  0x2a   : > { %495 = vperm.xlu2 %795, %v307_v3  }
  0x30   : > { %800 = vset.pattern.permute.xlu0 %v847_v15 }
  0x31   : > { %528 = vperm.xlu0 %800, %v307_v3   ;;  %797 = vset.pattern.permute.xlu1 %v848_v16 }
  0x32   : > { %506 = vperm.xlu1 %797, %v906_v1   ;;  %798 = vset.pattern.permute.xlu2 %v848_v16 }
  0x33   : > { %510 = vperm.xlu2 %798, %v307_v3  }
  0x39   : > { %804 = vset.pattern.permute.xlu0 %v849_v17 }
  0x3a   : > { %514 = vperm.xlu1 %797, %v901_v0  }
  0x3b   : > { %799 = vset.pattern.permute.xlu2 %v847_v15 }
  0x3c   : > { %524 = vperm.xlu2 %799, %v906_v1  }
  0x42   : > { %801 = vset.pattern.permute.xlu1 %v847_v15 }
  0x43   : > { %532 = vperm.xlu1 %801, %v901_v0  }
  0x44   : > { %802 = vset.pattern.permute.xlu2 %v849_v17 }
  0x45   : > { %542 = vperm.xlu2 %802, %v906_v1  }
  0x4b   : > { %803 = vset.pattern.permute.xlu1 %v849_v17 }
  0x4c   : > { %546 = vperm.xlu1 %803, %v307_v3  }
  0x4d   : > { %550 = vperm.xlu2 %802, %v901_v0  }
  0x6a   : > { %v937_v18 = vpop.permute.xlu2 %448 }
  0x72   : > { %v453_v20 = vpop.permute.xlu2 %452 }
  0x73   : > { %v458_v2 = vmul.f32 %v805_v53, %v453_v20 }
  0x7b   : > { %v939_v22 = vpop.permute.xlu2 %468 }
  0x7c   : > { %v474_v8 = vmul.f32 %v806_v54, %v939_v22 }
  0x80   : > { %v322_v19 = vpop.permute.xlu1 %321  ;;  %v312_v23 = vpop.permute.xlu0 %311 }
  0x84   : > { %v949_v31 = vpop.permute.xlu2 %495 }
  0x88   : > { %v317_v32 = vpop.permute.xlu0 %316 }
  0x89   : > { %v445_v21 = vpop.permute.xlu1 %444 }
  0x8a   : > { %v456_v59 = vmul.f32 %v805_v53, %v445_v21 }
  0x8d   : > { %v953_v42 = vpop.permute.xlu2 %510 }
  0x91   : > { %v461_v49 = vpop.permute.xlu0 %460 }
  0x92   : > { %v947_v26 = vpop.permute.xlu1 %464  ;;  %v472_v60 = vmul.f32 %v806_v54, %v461_v49 }
  0x94   : > { %v475_v9 = vadd.f32 %v472_v60, %v456_v59 }
  0x96   : > { %v960_v52 = vpop.permute.xlu2 %524 }
  0x9b   : > { %v951_v35 = vpop.permute.xlu1 %491 }
  0x9e   : > { %v372_v24 = vpop.f32.mrf.mxu0 }
  0x9f   : > { %v377_v25 = vpop.f32.mrf.mxu1  ;;  %v373_v27 = vadd.f32 %v372_v24, %v312_v23  ;;  %v543_v22 = vpop.permute.xlu2 %542  ;;  %v457_v24 = vmul.f32 %v805_v53, %v937_v18 }
  0xa0   : > { %v378_v28 = vadd.f32 %v377_v25, %v322_v19  ;;  %v500_v25 = vpop.permute.xlu0 %499 }
  0xa1   : > { %381 = vst [vmem:[%s285_s14] sm:$0xff] %v373_v27  ;;  %v737_v29 = vmul.f32 -1.442695, %v373_v27  ;;  %v477_v27 = vadd.f32 %v474_v8, %v458_v2 }
  0xa2   : > { %v739_v30 = vmul.f32 -1.442695, %v378_v28  ;;  %383 = vst [vmem:[%s285_s14 + $0x10] sm:$0xff] %v378_v28 }
  0xa3   : > { %807 = vpow2.f32 %v737_v29 }
  0xa4   : > { %809 = vpow2.f32 %v739_v30  ;;  %v955_v44 = vpop.permute.xlu1 %506  ;;  %v473_v30 = vmul.f32 %v806_v54, %v947_v26 }
  0xa6   : > { %v374_v33 = vpop.f32.mrf.mxu0 }
  0xa7   : > { %v379_v34 = vpop.f32.mrf.mxu1  ;;  %v375_v36 = vadd.f32 %v374_v33, %v317_v32  ;;  %v551_v54 = vpop.permute.xlu2 %550 }
  0xa9   : > { %v808_v37 = vpop.eup %807  ;;  %382 = vst [vmem:[%s285_s14 + $0x8] sm:$0xff] %v375_v36  ;;  %v738_v38 = vmul.f32 -1.442695, %v375_v36 }
  0xaa   : > { %v810_v39 = vpop.eup %809  ;;  %v393_v40 = vadd.f32 1.0, %v808_v37 }
  0xab   : > { %v395_v41 = vadd.f32 1.0, %v810_v39  ;;  %811 = vpow2.f32 %v738_v38 }
  0xac   : > { %813 = vrcp.f32 %v393_v40  ;;  %v407_v55 = vand.u32 2147483648, %v393_v40  ;;  %v405_v57 = vand.u32 2147483647, %v393_v40  ;;  %vm401_vm2 = vweird.f32 %v393_v40  ;;  %v515_v6 = vpop.permute.xlu1 %514 }
  0xad   : > { %815 = vrcp.f32 %v395_v41  ;;  %v437_v61 = vand.u32 2147483648, %v395_v41  ;;  %v435_v0 = vand.u32 2147483647, %v395_v41  ;;  %vm431_vm5 = vweird.f32 %v395_v41 }
  0xae   : > { %v408_v3 = vor.u32 1.1754944e-38, %v407_v55  ;;  %vm406_vm6 = vcmp.eq.f32.partialorder %v405_v57, 8.507059e+37  ;;  %v529_v55 = vpop.permute.xlu0 %528 }
  0xaf   : > { %v438_v11 = vor.u32 1.1754944e-38, %v437_v61  ;;  %vm436_vm8 = vcmp.eq.f32.partialorder %v435_v0, 8.507059e+37 }
  0xb1   : > { %v812_v43 = vpop.eup %811 }
  0xb2   : > { %v814_v45 = vpop.eup %813  ;;  %v957_v46 = vadd.f32 1.0, %v812_v43 }
  0xb3   : > { %v816_v47 = vpop.eup %815  ;;  %v397_v48 = vmul.f32 %v814_v45, %v393_v40  ;;  %vm402_vm1 = vweird.f32 %v814_v45 }
  0xb4   : > { %817 = vrcp.f32 %v957_v46  ;;  %v427_v51 = vmul.f32 %v816_v47, %v395_v41  ;;  %vm432_vm3 = vweird.f32 %v816_v47  ;;  %vm403_vm4 = vmor %vm401_vm2, %vm402_vm1  ;;  %v420_v15 = vand.u32 2147483647, %v957_v46 }
  0xb5   : > { %v398_v50 = vsub.f32 1.0, %v397_v48  ;;  %vm433_vm7 = vmor %vm431_vm5, %vm432_vm3  ;;  %v422_v16 = vand.u32 2147483648, %v957_v46  ;;  %vm416_vm10 = vweird.f32 %v957_v46 }
  0xb6   : > { %v428_v58 = vsub.f32 1.0, %v427_v51  ;;  %vm421_vm12 = vcmp.eq.f32.partialorder %v420_v15, 8.507059e+37 }
  0xb7   : > { %v399_v56 = vmul.f32 %v814_v45, %v398_v50  ;;  %v423_v32 = vor.u32 1.1754944e-38, %v422_v16 }
  0xb8   : > { %v429_v63 = vmul.f32 %v816_v47, %v428_v58 }
  0xb9   : > { %v400_v62 = vadd.f32 %v814_v45, %v399_v56 }
  0xba   : > { %v818_v1 = vpop.eup %817  ;;  %v430_v7 = vadd.f32 %v816_v47, %v429_v63 }
  0xbb   : > { %v404_v4 = vsel %vm403_vm4, %v814_v45, %v400_v62  ;;  %v412_v5 = vmul.f32 %v818_v1, %v957_v46  ;;  %vm417_vm9 = vweird.f32 %v818_v1  ;;  %v533_v45 = vpop.permute.xlu1 %532 }
  0xbc   : > { %v409_v10 = vsel %vm406_vm6, %v408_v3, %v404_v4  ;;  %v434_v14 = vsel %vm433_vm7, %v816_v47, %v430_v7  ;;  %vm418_vm11 = vmor %vm416_vm10, %vm417_vm9  ;;  %v476_v47 = vadd.f32 %v473_v30, %v457_v24 }
  0xbd   : > { %v478_v12 = vmul.f32 2.0, %v409_v10  ;;  %v413_v13 = vsub.f32 1.0, %v412_v5  ;;  %v439_v17 = vsel %vm436_vm8, %v438_v11, %v434_v14  ;;  %v535_v43 = vmul.f32 %v960_v52, %v409_v10 }
  0xbe   : > { %v480_v23 = vmul.f32 2.0, %v439_v17  ;;  %v537_v51 = vmul.f32 %v533_v45, %v439_v17 }
  0xbf   : > { %v740_v19 = vadd.f32 -0.5, %v478_v12  ;;  %v414_v20 = vmul.f32 %v818_v1, %v413_v13  ;;  %v487_v21 = vmul.f32 %v478_v12, %v478_v12 }
  0xc0   : > { %v489_v33 = vmul.f32 %v480_v23, %v480_v23  ;;  %v742_v34 = vadd.f32 -0.5, %v480_v23 }
  0xc1   : > { %v484_v28 = vadd.f32 %v740_v19, %v475_v9  ;;  %v415_v29 = vadd.f32 %v818_v1, %v414_v20  ;;  %v517_v18 = vmul.f32 %v955_v44, %v487_v21 }
  0xc2   : > { %v486_v39 = vadd.f32 %v742_v34, %v477_v27  ;;  %v519_v26 = vmul.f32 %v515_v6, %v489_v33 }
  0xc3   : > { %v502_v36 = vmul.f32 %v951_v35, %v484_v28  ;;  %v419_v37 = vsel %vm418_vm11, %v818_v1, %v415_v29  ;;  %v547_v61 = vpop.permute.xlu1 %546 }
  0xc4   : > { %v424_v38 = vsel %vm421_vm12, %v423_v32, %v419_v37  ;;  %v504_v46 = vmul.f32 %v500_v25, %v486_v39 }
  0xc5   : > { %v479_v40 = vmul.f32 2.0, %v424_v38  ;;  %v520_v41 = vadd.f32 %v517_v18, %v502_v36  ;;  %v536_v60 = vmul.f32 %v529_v55, %v424_v38 }
  0xc6   : > { %v522_v35 = vadd.f32 %v519_v26, %v504_v46 }
  0xc7   : > { %v741_v48 = vadd.f32 -0.5, %v479_v40  ;;  %v488_v49 = vmul.f32 %v479_v40, %v479_v40  ;;  %v538_v50 = vadd.f32 %v535_v43, %v520_v41 }
  0xc8   : > { %v540_v56 = vadd.f32 %v537_v51, %v522_v35 }
  0xc9   : > { %v485_v44 = vadd.f32 %v741_v48, %v476_v47  ;;  %v553_v53 = vmul.f32 %v543_v22, %v538_v50  ;;  %v518_v57 = vmul.f32 %v953_v42, %v488_v49 }
  0xca   : > { %v555_v58 = vmul.f32 %v551_v54, %v540_v56 }
  0xcb   : > { %v503_v52 = vmul.f32 %v949_v31, %v485_v44  ;;  %556 = vst [vmem:[%s293_s25] sm:$0xff] %v553_v53 }
  0xcc   : > { %558 = vst [vmem:[%s293_s25 + $0x10] sm:$0xff] %v555_v58 }
  0xcd   : > { %v521_v59 = vadd.f32 %v518_v57, %v503_v52 }
  0xcf   : > { %v539_v62 = vadd.f32 %v536_v60, %v521_v59 }
  0xd1   : > { %v554_v63 = vmul.f32 %v547_v61, %v539_v62 }
  0xd3   : > { %557 = vst [vmem:[%s293_s25 + $0x8] sm:$0xff] %v554_v63 }
  0xd4 PF: > { %s16_s20 = sadd.s32 1, %s841_s20   ;;  %s1002_s18 = smov %s837_s19 }
  0xd5   : > { %p13_p5 = scmp.ge.s32.totalorder %s16_s20, 4   ;;  %s1003_s19 = smov %s1005_s21 }
  0xd7   :  { %15 = sbr.rel (!%p13_p5) target bundleno = 2 (0x2), region = 81 }

</bundles_post_ra>
